<compile_context>
chip_gen: v7x
topology: tpu7x:2x2x1
jax: 0.10.0
libtpu: 0.0.40
codegen_flags: <defaults>
</compile_context>

<pallas_src>
import functools
import math

import jax
import jax.numpy as jnp
from jax.experimental import pallas as pl
from jax.experimental.pallas import tpu as pltpu


# ----------------------------------------------------------------------------
# helpers
# ----------------------------------------------------------------------------
def _round_up(x, m):
    return (x + m - 1) // m * m


def _largest_divisor_tile(dim, cap):
    """Largest multiple of 128 that divides `dim` (dim % 128 == 0) and is <= cap."""
    best, t = 128, 128
    cap = min(cap, dim)
    while t <= cap:
        if dim % t == 0:
            best = t
        t += 128
    return best


_VMEM_LIMIT = None


def _vmem_limit_bytes():
    """Generation-aware scoped-VMEM limit: ~48 MiB on v7x (64 MiB/TC), 96 MiB on v5e/v6e."""
    global _VMEM_LIMIT
    if _VMEM_LIMIT is None:
        try:
            phys = int(pltpu.get_tpu_info().vmem_capacity_bytes)
        except Exception:  # conservative fallback if the query is unavailable
            phys = 64 * 1024 * 1024
        _VMEM_LIMIT = int(min(96 * 1024 * 1024,
                              max(32 * 1024 * 1024, (phys * 3) // 4)))
    return _VMEM_LIMIT


# ----------------------------------------------------------------------------
# fused (matmul + bias + optional residual + optional ReLU) kernel
#   - weight is pre-folded / pre-padded bf16, bias is f32 (1, N_pad)
#   - f32 MXU accumulation; multi-K accumulates in an f32 VMEM scratch and the
#     final partial product is folded into the epilogue (no redundant RMW).
# ----------------------------------------------------------------------------
def _make_kernel(has_res, relu, multi_k):
    def kernel(x_ref, w_ref, b_ref, *rest):
        idx = 0
        r_ref = None
        if has_res:
            r_ref = rest[idx]
            idx += 1
        o_ref = rest[idx]
        acc_ref = rest[idx + 1] if multi_k else None

        prod = jnp.dot(x_ref[...], w_ref[...],
                       preferred_element_type=jnp.float32)

        def epilogue(acc):
            y = acc + b_ref[...]
            if has_res:
                y = y + r_ref[...].astype(jnp.float32)
            if relu:
                y = jnp.maximum(y, 0.0)
            o_ref[...] = y.astype(o_ref.dtype)

        if not multi_k:
            epilogue(prod)
        else:
            k = pl.program_id(2)
            nk = pl.num_programs(2)

            @pl.when(k == 0)
            def _():
                acc_ref[...] = prod

            @pl.when(jnp.logical_and(k > 0, k < nk - 1))
            def _():
                acc_ref[...] = acc_ref[...] + prod

            @pl.when(k == nk - 1)
            def _():
                epilogue(acc_ref[...] + prod)

    return kernel


def fused_matmul(x, wp, bp, residual=None, relu=False, out_dtype=jnp.float32):
    """out = act(x @ wp + bp (+ residual)); the padded N width is kept.

    x: (M, K) (cast to bf16), wp: (K, N_pad) bf16 pre-padded weight,
    bp: (1, N_pad) f32, residual: (M, N_pad) f32 or None.  Returns (M, N_pad).
    """
    x = x.astype(jnp.bfloat16)
    M, K = x.shape
    K_pad, N_pad = wp.shape
    assert K == K_pad, (K, K_pad)

    # M tiling: split big M so grid axis 0 has >1 block (megacore / pipelining).
    if M > 512:
        tm = 512
        M_pad = _round_up(M, tm)
    else:
        M_pad = _round_up(M, 16)
        tm = M_pad

    # K tiling: full K in one block unless it is very large.
    tk = _largest_divisor_tile(K_pad, 6144) if K_pad > 8192 else K_pad
    nk = K_pad // tk
    multi_k = nk > 1

    # N tiling: honest byte math (bf16 weight = 2 B/elem, 2-3 deep pipeline).
    nbuf = 3 if multi_k else 2
    budget = 24 * 1024 * 1024
    tn_cap = max(128, (budget // (nbuf * 2 * tk)) // 128 * 128)
    tn = _largest_divisor_tile(N_pad, tn_cap)

    xp = x if M_pad == M else jnp.pad(x, ((0, M_pad - M), (0, 0)))

    if multi_k:
        w_spec = pl.BlockSpec((tk, tn), lambda i, j, k: (k, j),
                              pipeline_mode=pl.Buffered(3))
    else:
        w_spec = pl.BlockSpec((tk, tn), lambda i, j, k: (k, j))

    in_specs = [
        pl.BlockSpec((tm, tk), lambda i, j, k: (i, k)),
        w_spec,
        pl.BlockSpec((1, tn), lambda i, j, k: (0, j)),
    ]
    args = [xp, wp, bp]

    has_res = residual is not None
    if has_res:
        rp = residual.astype(jnp.float32)
        if M_pad != M:
            rp = jnp.pad(rp, ((0, M_pad - M), (0, 0)))
        in_specs.append(pl.BlockSpec((tm, tn), lambda i, j, k: (i, j)))
        args.append(rp)

    scratch = [pltpu.VMEM((tm, tn), jnp.float32)] if multi_k else []

    out = pl.pallas_call(
        _make_kernel(has_res, relu, multi_k),
        out_shape=jax.ShapeDtypeStruct((M_pad, N_pad), out_dtype),
        grid_spec=pltpu.PrefetchScalarGridSpec(
            num_scalar_prefetch=0,
            grid=(M_pad // tm, N_pad // tn, nk),
            in_specs=in_specs,
            out_specs=pl.BlockSpec((tm, tn), lambda i, j, k: (i, j)),
            scratch_shapes=scratch),
        compiler_params=pltpu.CompilerParams(
            dimension_semantics=("parallel", "parallel", "arbitrary"),
            vmem_limit_bytes=_vmem_limit_bytes()),
    )(*args)
    return out[:M]


# ----------------------------------------------------------------------------
# Conv1d (+ folded BN, optional residual / ReLU) via im2col + fused matmul
# ----------------------------------------------------------------------------
def _extract_patches(x, k, stride, padding):
    # x: (B, L, C_pad) -> (B, Lout, k*C_pad)
    if padding:
        x = jnp.pad(x, ((0, 0), (padding, padding), (0, 0)))
    B, L, C = x.shape
    Lout = (L - k) // stride + 1
    cols = [x[:, j:j + stride * (Lout - 1) + 1:stride, :] for j in range(k)]
    p = jnp.stack(cols, axis=2)                       # (B, Lout, k, C_pad)
    return p.reshape(B, Lout, k * C), Lout


def conv_bn(x, w, b, *, k, stride=1, padding=0, relu=True, residual=None,
            out_dtype=jnp.float32):
    B = x.shape[0]
    xb = x.astype(jnp.bfloat16)
    if k == 1 and stride == 1 and padding == 0:
        Lout = xb.shape[1]
        pm = xb.reshape(B * Lout, -1)                 # 1x1 conv: plain matmul
    else:
        patches, Lout = _extract_patches(xb, k, stride, padding)
        pm = patches.reshape(B * Lout, -1)
    cpad = w.shape[1]
    res = None if residual is None else residual.reshape(B * Lout, cpad)
    out = fused_matmul(pm, w, b, residual=res, relu=relu, out_dtype=out_dtype)
    return out.reshape(B, Lout, cpad)


# ----------------------------------------------------------------------------
# parameters: init (random, matching the conv shapes) + one-time preparation
# (fold eval-mode BN, pad channels to multiples of 128, cast to bf16)
# ----------------------------------------------------------------------------
def _conv_w(key, k, cin, cout):
    std = math.sqrt(2.0 / (cout * k))                 # kaiming-style init
    return std * jax.random.normal(key, (k, cin, cout), jnp.float32)


def _bn(cout, eps=1e-5):
    # eval-mode BN with fresh stats: weight=1, bias=0, mean=0, var=1
    scale = jnp.full((cout,), 1.0 / math.sqrt(1.0 + eps), jnp.float32)
    shift = jnp.zeros((cout,), jnp.float32)
    return scale, shift


def _prep_conv(w, bn_scale, bn_shift, cin_pad, cout_pad):
    k, cin, cout = w.shape
    wf = (w * bn_scale[None, None, :]).astype(jnp.float32)   # fold BN scale
    wp = jnp.zeros((k, cin_pad, cout_pad), jnp.float32)
    wp = wp.at[:, :cin, :cout].set(wf)
    wp = wp.reshape(k * cin_pad, cout_pad).astype(jnp.bfloat16)
    bp = jnp.zeros((1, cout_pad), jnp.float32).at[0, :cout].set(bn_shift)
    return wp, bp


def init_bottleneck(key, *, in_places, places, downsampling, expansion=4):
    k1, k2, k3, kd = jax.random.split(key, 4)
    out_places = places * expansion
    raw = {"w1": _conv_w(k1, 7, in_places, places),
           "w2": _conv_w(k2, 7, places, places),
           "w3": _conv_w(k3, 1, places, out_places)}
    if downsampling:
        raw["wd"] = _conv_w(kd, 11, in_places, out_places)
    return raw


def prepare_bottleneck(raw, *, in_places, places, downsampling, expansion=4,
                       eps=1e-5):
    out_places = places * expansion
    cin_pad = _round_up(in_places, 128)
    mid_pad = _round_up(places, 128)
    out_pad = _round_up(out_places, 128)
    w1, b1 = _prep_conv(raw["w1"], *_bn(places, eps), cin_pad, mid_pad)
    w2, b2 = _prep_conv(raw["w2"], *_bn(places, eps), mid_pad, mid_pad)
    w3, b3 = _prep_conv(raw["w3"], *_bn(out_places, eps), mid_pad, out_pad)
    params = {"w1": w1, "b1": b1, "w2": w2, "b2": b2, "w3": w3, "b3": b3}
    if downsampling:
        wd, bd = _prep_conv(raw["wd"], *_bn(out_places, eps), cin_pad, out_pad)
        params["wd"], params["bd"] = wd, bd
    return params


# ----------------------------------------------------------------------------
# Bottleneck forward (PyTorch NCL layout at the boundary)
# ----------------------------------------------------------------------------
@functools.partial(jax.jit, static_argnames=("cout", "stride", "downsampling"))
def bottleneck_forward(params, x_ncl, *, cout, stride, downsampling):
    B, C, L = x_ncl.shape
    cin_pad = params["w1"].shape[0] // 7

    x = jnp.transpose(x_ncl, (0, 2, 1)).astype(jnp.bfloat16)   # NCL -> NLC
    if cin_pad > C:
        x = jnp.pad(x, ((0, 0), (0, 0), (0, cin_pad - C)))

    # main path: Conv7(s=1)+BN+ReLU -> Conv7(s=stride,p=1)+BN+ReLU -> Conv1+BN
    h = conv_bn(x, params["w1"], params["b1"], k=7, stride=1, padding=0,
                relu=True, out_dtype=jnp.bfloat16)
    h = conv_bn(h, params["w2"], params["b2"], k=7, stride=stride, padding=1,
                relu=True, out_dtype=jnp.bfloat16)

    if downsampling:
        res = conv_bn(x, params["wd"], params["bd"], k=11, stride=stride,
                      padding=0, relu=False, out_dtype=jnp.float32)
    else:
        # identity shortcut: only shape-valid when the convs preserve (C, L),
        # exactly as in the PyTorch reference.
        cp = params["w3"].shape[1]
        res = jnp.transpose(x_ncl, (0, 2, 1)).astype(jnp.float32)
        if cp > C:
            res = jnp.pad(res, ((0, 0), (0, 0), (0, cp - C)))

    # out += residual; out = ReLU(out)  -- fused into the 1x1 conv epilogue
    out = conv_bn(h, params["w3"], params["b3"], k=1, stride=1, padding=0,
                  relu=True, residual=res, out_dtype=jnp.float32)

    out = out[:, :, :cout]
    return jnp.transpose(out, (0, 2, 1))                        # NLC -> NCL


# ----------------------------------------------------------------------------
# pure-JAX reference (same eval-mode BN semantics) for a correctness check
# ----------------------------------------------------------------------------
def _reference_bottleneck(raw, x_ncl, *, stride, downsampling, eps=1e-5):
    def conv(x, w, s, p):
        return jax.lax.conv_general_dilated(
            x, jnp.transpose(w, (2, 1, 0)), window_strides=(s,),
            padding=[(p, p)], dimension_numbers=("NCW", "OIW", "NCW"),
            precision=jax.lax.Precision.HIGHEST)

    def bn(t):
        return t * (1.0 / math.sqrt(1.0 + eps))

    h = jax.nn.relu(bn(conv(x_ncl, raw["w1"], 1, 0)))
    h = jax.nn.relu(bn(conv(h, raw["w2"], stride, 1)))
    h = bn(conv(h, raw["w3"], 1, 0))
    r = bn(conv(x_ncl, raw["wd"], stride, 0)) if downsampling else x_ncl
    return jax.nn.relu(h + r)


# ----------------------------------------------------------------------------
if __name__ == "__main__":
    IN_PLACES, PLACES, STRIDE, EXPANSION = 32, 16, 2, 4
    OUT_PLACES = PLACES * EXPANSION
    B, L = 2, 64

    key = jax.random.PRNGKey(0)
    pkey, xkey = jax.random.split(key)
    raw = init_bottleneck(pkey, in_places=IN_PLACES, places=PLACES,
                          downsampling=True, expansion=EXPANSION)
    params = prepare_bottleneck(raw, in_places=IN_PLACES, places=PLACES,
                                downsampling=True, expansion=EXPANSION)

    x = jax.random.normal(xkey, (B, IN_PLACES, L), jnp.float32)

    out = jax.block_until_ready(
        bottleneck_forward(params, x, cout=OUT_PLACES, stride=STRIDE,
                           downsampling=True))

    L1 = L - 6                                   # conv1: k=7, s=1, p=0
    L2 = (L1 + 2 - 7) // STRIDE + 1              # conv2: k=7, s=stride, p=1
    assert out.shape == (B, OUT_PLACES, L2), out.shape
    assert bool(jnp.all(jnp.isfinite(out)))

    ref = _reference_bottleneck(raw, x, stride=STRIDE, downsampling=True)
    err = float(jnp.max(jnp.abs(out - ref)))
    scale = float(jnp.max(jnp.abs(ref))) + 1e-6
    assert err <= 0.05 * scale + 0.1, (err, scale)   # bf16-weight tolerance

    print("KERNEL_OK")
</pallas_src>

<mosaic_0001>
module attributes {stable_mosaic.version = 11 : i64} {
  func.func @kernel(%arg0: i32, %arg1: i32, %arg2: i32, %arg3: memref<64x1408xbf16, #tpu.memory_space<vmem>>, %arg4: memref<1408x128xbf16, #tpu.memory_space<vmem>>, %arg5: memref<1x128xf32, #tpu.memory_space<vmem>>, %arg6: memref<64x128xf32, #tpu.memory_space<vmem>>) attributes {dimension_semantics = [#tpu.dimension_semantics<parallel>, #tpu.dimension_semantics<parallel>, #tpu.dimension_semantics<arbitrary>], iteration_bounds = array<i64: 1, 1, 1>, scalar_prefetch = 0 : i64, scratch_operands = 0 : i64, tpu.core_type = #tpu.core_type<tc>, window_params = [{transform_indices = @transform_0, window_bounds = array<i64: 64, 1408>}, {transform_indices = @transform_1, window_bounds = array<i64: 1408, 128>}, {transform_indices = @transform_2, window_bounds = array<i64: 1, 128>}, {transform_indices = @transform_3, window_bounds = array<i64: 64, 128>}]} {
    %c0 = arith.constant 0 : index
    %c0_0 = arith.constant 0 : index
    %0 = vector.load %arg3[%c0, %c0_0] : memref<64x1408xbf16, #tpu.memory_space<vmem>>, vector<64x1408xbf16>
    %c0_1 = arith.constant 0 : index
    %c0_2 = arith.constant 0 : index
    %1 = vector.load %arg4[%c0_1, %c0_2] : memref<1408x128xbf16, #tpu.memory_space<vmem>>, vector<1408x128xbf16>
    %cst = arith.constant dense<0.000000e+00> : vector<64x128xf32>
    %2 = tpu.matmul %0, %1, %cst {dimension_numbers = #tpu.dot_dimension_numbers<[1], [0], [0], [1], [0, 0, 1, 1], [], []>} : vector<64x1408xbf16>, vector<1408x128xbf16>, vector<64x128xf32> -> vector<64x128xf32>
    %c0_3 = arith.constant 0 : index
    %c0_4 = arith.constant 0 : index
    %3 = vector.load %arg5[%c0_3, %c0_4] : memref<1x128xf32, #tpu.memory_space<vmem>>, vector<1x128xf32>
    %4 = vector.broadcast %3 : vector<1x128xf32> to vector<64x128xf32>
    %5 = arith.addf %2, %4 : vector<64x128xf32>
    %c0_5 = arith.constant 0 : index
    %c0_6 = arith.constant 0 : index
    %6 = vector.load %arg6[%c0_5, %c0_6] : memref<64x128xf32, #tpu.memory_space<vmem>>, vector<64x128xf32>
    tpu.vector_store %arg6[%c0_5, %c0_6], %5 {strides = array<i32>} : memref<64x128xf32, #tpu.memory_space<vmem>>, vector<64x128xf32>,
    return
  }
  func.func @transform_0(%arg0: i32, %arg1: i32, %arg2: i32) -> (i32, i32) {
    %c0_i32 = arith.constant 0 : i32
    return %arg0, %arg2 : i32, i32
  }
  func.func @transform_1(%arg0: i32, %arg1: i32, %arg2: i32) -> (i32, i32) {
    %c0_i32 = arith.constant 0 : i32
    return %arg2, %arg1 : i32, i32
  }
  func.func @transform_2(%arg0: i32, %arg1: i32, %arg2: i32) -> (i32, i32) {
    %c0_i32 = arith.constant 0 : i32
    %c0_i32_0 = arith.constant 0 : i32
    return %c0_i32, %arg1 : i32, i32
  }
  func.func @transform_3(%arg0: i32, %arg1: i32, %arg2: i32) -> (i32, i32) {
    %c0_i32 = arith.constant 0 : i32
    return %arg0, %arg1 : i32, i32
  }
}

module attributes {stable_mosaic.version = 11 : i64} {
  func.func @kernel(%arg0: i32, %arg1: i32, %arg2: i32, %arg3: memref<128x896xbf16, #tpu.memory_space<vmem>>, %arg4: memref<896x128xbf16, #tpu.memory_space<vmem>>, %arg5: memref<1x128xf32, #tpu.memory_space<vmem>>, %arg6: memref<128x128xbf16, #tpu.memory_space<vmem>>) attributes {dimension_semantics = [#tpu.dimension_semantics<parallel>, #tpu.dimension_semantics<parallel>, #tpu.dimension_semantics<arbitrary>], iteration_bounds = array<i64: 1, 1, 1>, scalar_prefetch = 0 : i64, scratch_operands = 0 : i64, tpu.core_type = #tpu.core_type<tc>, window_params = [{transform_indices = @transform_0, window_bounds = array<i64: 128, 896>}, {transform_indices = @transform_1, window_bounds = array<i64: 896, 128>}, {transform_indices = @transform_2, window_bounds = array<i64: 1, 128>}, {transform_indices = @transform_3, window_bounds = array<i64: 128, 128>}]} {
    %c0 = arith.constant 0 : index
    %c0_0 = arith.constant 0 : index
    %0 = vector.load %arg3[%c0, %c0_0] : memref<128x896xbf16, #tpu.memory_space<vmem>>, vector<128x896xbf16>
    %c0_1 = arith.constant 0 : index
    %c0_2 = arith.constant 0 : index
    %1 = vector.load %arg4[%c0_1, %c0_2] : memref<896x128xbf16, #tpu.memory_space<vmem>>, vector<896x128xbf16>
    %cst = arith.constant dense<0.000000e+00> : vector<128x128xf32>
    %2 = tpu.matmul %0, %1, %cst {dimension_numbers = #tpu.dot_dimension_numbers<[1], [0], [0], [1], [0, 0, 1, 1], [], []>} : vector<128x896xbf16>, vector<896x128xbf16>, vector<128x128xf32> -> vector<128x128xf32>
    %c0_3 = arith.constant 0 : index
    %c0_4 = arith.constant 0 : index
    %3 = vector.load %arg5[%c0_3, %c0_4] : memref<1x128xf32, #tpu.memory_space<vmem>>, vector<1x128xf32>
    %4 = vector.broadcast %3 : vector<1x128xf32> to vector<128x128xf32>
    %5 = arith.addf %2, %4 : vector<128x128xf32>
    %cst_5 = arith.constant 0.000000e+00 : f32
    %6 = vector.broadcast %cst_5 : f32 to vector<128x128xf32>
    %7 = arith.maximumf %5, %6 : vector<128x128xf32>
    %8 = arith.truncf %7 : vector<128x128xf32> to vector<128x128xbf16>
    %c0_6 = arith.constant 0 : index
    %c0_7 = arith.constant 0 : index
    %9 = vector.load %arg6[%c0_6, %c0_7] : memref<128x128xbf16, #tpu.memory_space<vmem>>, vector<128x128xbf16>
    tpu.vector_store %arg6[%c0_6, %c0_7], %8 {strides = array<i32>} : memref<128x128xbf16, #tpu.memory_space<vmem>>, vector<128x128xbf16>,
    return
  }
  func.func @transform_0(%arg0: i32, %arg1: i32, %arg2: i32) -> (i32, i32) {
    %c0_i32 = arith.constant 0 : i32
    return %arg0, %arg2 : i32, i32
  }
  func.func @transform_1(%arg0: i32, %arg1: i32, %arg2: i32) -> (i32, i32) {
    %c0_i32 = arith.constant 0 : i32
    return %arg2, %arg1 : i32, i32
  }
  func.func @transform_2(%arg0: i32, %arg1: i32, %arg2: i32) -> (i32, i32) {
    %c0_i32 = arith.constant 0 : i32
    %c0_i32_0 = arith.constant 0 : i32
    return %c0_i32, %arg1 : i32, i32
  }
  func.func @transform_3(%arg0: i32, %arg1: i32, %arg2: i32) -> (i32, i32) {
    %c0_i32 = arith.constant 0 : i32
    return %arg0, %arg1 : i32, i32
  }
}

module attributes {stable_mosaic.version = 11 : i64} {
  func.func @kernel(%arg0: i32, %arg1: i32, %arg2: i32, %arg3: memref<64x896xbf16, #tpu.memory_space<vmem>>, %arg4: memref<896x128xbf16, #tpu.memory_space<vmem>>, %arg5: memref<1x128xf32, #tpu.memory_space<vmem>>, %arg6: memref<64x128xbf16, #tpu.memory_space<vmem>>) attributes {dimension_semantics = [#tpu.dimension_semantics<parallel>, #tpu.dimension_semantics<parallel>, #tpu.dimension_semantics<arbitrary>], iteration_bounds = array<i64: 1, 1, 1>, scalar_prefetch = 0 : i64, scratch_operands = 0 : i64, tpu.core_type = #tpu.core_type<tc>, window_params = [{transform_indices = @transform_0, window_bounds = array<i64: 64, 896>}, {transform_indices = @transform_1, window_bounds = array<i64: 896, 128>}, {transform_indices = @transform_2, window_bounds = array<i64: 1, 128>}, {transform_indices = @transform_3, window_bounds = array<i64: 64, 128>}]} {
    %c0 = arith.constant 0 : index
    %c0_0 = arith.constant 0 : index
    %0 = vector.load %arg3[%c0, %c0_0] : memref<64x896xbf16, #tpu.memory_space<vmem>>, vector<64x896xbf16>
    %c0_1 = arith.constant 0 : index
    %c0_2 = arith.constant 0 : index
    %1 = vector.load %arg4[%c0_1, %c0_2] : memref<896x128xbf16, #tpu.memory_space<vmem>>, vector<896x128xbf16>
    %cst = arith.constant dense<0.000000e+00> : vector<64x128xf32>
    %2 = tpu.matmul %0, %1, %cst {dimension_numbers = #tpu.dot_dimension_numbers<[1], [0], [0], [1], [0, 0, 1, 1], [], []>} : vector<64x896xbf16>, vector<896x128xbf16>, vector<64x128xf32> -> vector<64x128xf32>
    %c0_3 = arith.constant 0 : index
    %c0_4 = arith.constant 0 : index
    %3 = vector.load %arg5[%c0_3, %c0_4] : memref<1x128xf32, #tpu.memory_space<vmem>>, vector<1x128xf32>
    %4 = vector.broadcast %3 : vector<1x128xf32> to vector<64x128xf32>
    %5 = arith.addf %2, %4 : vector<64x128xf32>
    %cst_5 = arith.constant 0.000000e+00 : f32
    %6 = vector.broadcast %cst_5 : f32 to vector<64x128xf32>
    %7 = arith.maximumf %5, %6 : vector<64x128xf32>
    %8 = arith.truncf %7 : vector<64x128xf32> to vector<64x128xbf16>
    %c0_6 = arith.constant 0 : index
    %c0_7 = arith.constant 0 : index
    %9 = vector.load %arg6[%c0_6, %c0_7] : memref<64x128xbf16, #tpu.memory_space<vmem>>, vector<64x128xbf16>
    tpu.vector_store %arg6[%c0_6, %c0_7], %8 {strides = array<i32>} : memref<64x128xbf16, #tpu.memory_space<vmem>>, vector<64x128xbf16>,
    return
  }
  func.func @transform_0(%arg0: i32, %arg1: i32, %arg2: i32) -> (i32, i32) {
    %c0_i32 = arith.constant 0 : i32
    return %arg0, %arg2 : i32, i32
  }
  func.func @transform_1(%arg0: i32, %arg1: i32, %arg2: i32) -> (i32, i32) {
    %c0_i32 = arith.constant 0 : i32
    return %arg2, %arg1 : i32, i32
  }
  func.func @transform_2(%arg0: i32, %arg1: i32, %arg2: i32) -> (i32, i32) {
    %c0_i32 = arith.constant 0 : i32
    %c0_i32_0 = arith.constant 0 : i32
    return %c0_i32, %arg1 : i32, i32
  }
  func.func @transform_3(%arg0: i32, %arg1: i32, %arg2: i32) -> (i32, i32) {
    %c0_i32 = arith.constant 0 : i32
    return %arg0, %arg1 : i32, i32
  }
}

module attributes {stable_mosaic.version = 11 : i64} {
  func.func @kernel(%arg0: i32, %arg1: i32, %arg2: i32, %arg3: memref<64x128xbf16, #tpu.memory_space<vmem>>, %arg4: memref<128x128xbf16, #tpu.memory_space<vmem>>, %arg5: memref<1x128xf32, #tpu.memory_space<vmem>>, %arg6: memref<64x128xf32, #tpu.memory_space<vmem>>, %arg7: memref<64x128xf32, #tpu.memory_space<vmem>>) attributes {dimension_semantics = [#tpu.dimension_semantics<parallel>, #tpu.dimension_semantics<parallel>, #tpu.dimension_semantics<arbitrary>], iteration_bounds = array<i64: 1, 1, 1>, scalar_prefetch = 0 : i64, scratch_operands = 0 : i64, tpu.core_type = #tpu.core_type<tc>, window_params = [{transform_indices = @transform_0, window_bounds = array<i64: 64, 128>}, {transform_indices = @transform_1, window_bounds = array<i64: 128, 128>}, {transform_indices = @transform_2, window_bounds = array<i64: 1, 128>}, {transform_indices = @transform_3, window_bounds = array<i64: 64, 128>}, {transform_indices = @transform_4, window_bounds = array<i64: 64, 128>}]} {
    %c0 = arith.constant 0 : index
    %c0_0 = arith.constant 0 : index
    %0 = vector.load %arg3[%c0, %c0_0] : memref<64x128xbf16, #tpu.memory_space<vmem>>, vector<64x128xbf16>
    %c0_1 = arith.constant 0 : index
    %c0_2 = arith.constant 0 : index
    %1 = vector.load %arg4[%c0_1, %c0_2] : memref<128x128xbf16, #tpu.memory_space<vmem>>, vector<128x128xbf16>
    %cst = arith.constant dense<0.000000e+00> : vector<64x128xf32>
    %2 = tpu.matmul %0, %1, %cst {dimension_numbers = #tpu.dot_dimension_numbers<[1], [0], [0], [1], [0, 0, 1, 1], [], []>} : vector<64x128xbf16>, vector<128x128xbf16>, vector<64x128xf32> -> vector<64x128xf32>
    %c0_3 = arith.constant 0 : index
    %c0_4 = arith.constant 0 : index
    %3 = vector.load %arg5[%c0_3, %c0_4] : memref<1x128xf32, #tpu.memory_space<vmem>>, vector<1x128xf32>
    %4 = vector.broadcast %3 : vector<1x128xf32> to vector<64x128xf32>
    %5 = arith.addf %2, %4 : vector<64x128xf32>
    %c0_5 = arith.constant 0 : index
    %c0_6 = arith.constant 0 : index
    %6 = vector.load %arg6[%c0_5, %c0_6] : memref<64x128xf32, #tpu.memory_space<vmem>>, vector<64x128xf32>
    %7 = arith.addf %5, %6 : vector<64x128xf32>
    %cst_7 = arith.constant 0.000000e+00 : f32
    %8 = vector.broadcast %cst_7 : f32 to vector<64x128xf32>
    %9 = arith.maximumf %7, %8 : vector<64x128xf32>
    %c0_8 = arith.constant 0 : index
    %c0_9 = arith.constant 0 : index
    %10 = vector.load %arg7[%c0_8, %c0_9] : memref<64x128xf32, #tpu.memory_space<vmem>>, vector<64x128xf32>
    tpu.vector_store %arg7[%c0_8, %c0_9], %9 {strides = array<i32>} : memref<64x128xf32, #tpu.memory_space<vmem>>, vector<64x128xf32>,
    return
  }
  func.func @transform_0(%arg0: i32, %arg1: i32, %arg2: i32) -> (i32, i32) {
    %c0_i32 = arith.constant 0 : i32
    return %arg0, %arg2 : i32, i32
  }
  func.func @transform_1(%arg0: i32, %arg1: i32, %arg2: i32) -> (i32, i32) {
    %c0_i32 = arith.constant 0 : i32
    return %arg2, %arg1 : i32, i32
  }
  func.func @transform_2(%arg0: i32, %arg1: i32, %arg2: i32) -> (i32, i32) {
    %c0_i32 = arith.constant 0 : i32
    %c0_i32_0 = arith.constant 0 : i32
    return %c0_i32, %arg1 : i32, i32
  }
  func.func @transform_3(%arg0: i32, %arg1: i32, %arg2: i32) -> (i32, i32) {
    %c0_i32 = arith.constant 0 : i32
    return %arg0, %arg1 : i32, i32
  }
  func.func @transform_4(%arg0: i32, %arg1: i32, %arg2: i32) -> (i32, i32) {
    %c0_i32 = arith.constant 0 : i32
    return %arg0, %arg1 : i32, i32
  }
}

</mosaic_0001>

<bundles_post_ra>
// kernel: bottleneck_forward.6
= control target key start
LH: loop header
LB: loop body
LE: loop exit
PB: predicated region body
PF: predicated region fallthrough
CT: control target
= control target key end

     0   :  { %s2364_s1 = inlined_call_operand.vmem [shape: bf16[1408,128], index: 1, kind: input, shape index: {}]   ;;  %s2365_s0 = inlined_call_operand.vmem [shape: bf16[64,1408], index: 0, kind: input, shape index: {}]   ;;  %s2366_s2 = inlined_call_operand.vmem [shape: f32[1,128], index: 2, kind: input, shape index: {}]   ;;  %s2367_s3 = inlined_call_operand.vmem [shape: f32[64,128], index: 3, kind: output, shape index: {}]  }
   0x1   :  { %v1769_v0 = vld [vmem:[%s2364_s1 + $0x40] sm:$0xff]   ;;  %v1773_v4 = vld [vmem:[%s2364_s1 + $0x48] sm:$0xff]   ;;  %v1777_v8 = vld [vmem:[%s2364_s1 + $0x50] sm:$0xff]  }
   0x2   :  { %v1770_v1 = vld [vmem:[%s2364_s1] sm:$0xff]   ;;  %1533 = vmatprep.subr.bf16.mxu0 %v1769_v0  ;;  %v1774_v5 = vld [vmem:[%s2364_s1 + $0x8] sm:$0xff]   ;;  %v1778_v9 = vld [vmem:[%s2364_s1 + $0x10] sm:$0xff]  }
   0x3   :  { %v1771_v2 = vld [vmem:[%s2364_s1 + $0xc0] sm:$0xff]   ;;  %1534 = vmatpush3.bf16.msra.mxu0 %v1770_v1  ;;  %v1775_v6 = vld [vmem:[%s2364_s1 + $0xc8] sm:$0xff]   ;;  %v1779_v10 = vld [vmem:[%s2364_s1 + $0xd0] sm:$0xff]  }
   0x4   :  { %v1772_v3 = vld [vmem:[%s2364_s1 + $0x80] sm:$0xff]   ;;  %1573 = vmatprep.subr.bf16.mxu1 %v1771_v2  ;;  %1535 = vmatprep.subr.bf16.mxu0 %v1773_v4  ;;  %v1776_v7 = vld [vmem:[%s2364_s1 + $0x88] sm:$0xff]   ;;  %v1780_v11 = vld [vmem:[%s2364_s1 + $0x90] sm:$0xff]  }
   0x5   :  { %1574 = vmatpush3.bf16.msra.mxu1 %v1772_v3  ;;  %v1781_v12 = vld [vmem:[%s2364_s1 + $0x58] sm:$0xff]   ;;  %v1785_v16 = vld [vmem:[%s2364_s1 + $0x60] sm:$0xff]   ;;  %v1789_v20 = vld [vmem:[%s2364_s1 + $0x68] sm:$0xff]  }
   0x6   :  { %1575 = vmatprep.subr.bf16.mxu1 %v1775_v6  ;;  %v1782_v13 = vld [vmem:[%s2364_s1 + $0x18] sm:$0xff]   ;;  %v1786_v17 = vld [vmem:[%s2364_s1 + $0x20] sm:$0xff]   ;;  %v1790_v21 = vld [vmem:[%s2364_s1 + $0x28] sm:$0xff]  }
   0x7   :  { %1536 = vmatpush3.bf16.msra.mxu0 %v1774_v5  ;;  %v1783_v14 = vld [vmem:[%s2364_s1 + $0xd8] sm:$0xff]   ;;  %v1787_v18 = vld [vmem:[%s2364_s1 + $0xe0] sm:$0xff]   ;;  %v1791_v22 = vld [vmem:[%s2364_s1 + $0xe8] sm:$0xff]  }
   0x8   :  { %1537 = vmatprep.subr.bf16.mxu0 %v1777_v8  ;;  %v1784_v15 = vld [vmem:[%s2364_s1 + $0x98] sm:$0xff]   ;;  %v1788_v19 = vld [vmem:[%s2364_s1 + $0xa0] sm:$0xff]   ;;  %v1792_v23 = vld [vmem:[%s2364_s1 + $0xa8] sm:$0xff]  }
   0x9   :  { %1576 = vmatpush3.bf16.msra.mxu1 %v1776_v7  ;;  %v1793_v24 = vld [vmem:[%s2364_s1 + $0x70] sm:$0xff]   ;;  %v1797_v28 = vld [vmem:[%s2364_s1 + $0x78] sm:$0xff]   ;;  %v1800_v31 = vld [vmem:[%s2365_s0] ss:$44 sps:$4 sm:$0xff]  }
   0xa   :  { %1577 = vmatprep.subr.bf16.mxu1 %v1779_v10  ;;  %v1794_v25 = vld [vmem:[%s2364_s1 + $0x30] sm:$0xff]   ;;  %v1798_v29 = vld [vmem:[%s2364_s1 + $0x38] sm:$0xff]   ;;  %v1804_v34 = vld [vmem:[%s2364_s1 + $0x140] sm:$0xff]  }
   0xb   :  { %1538 = vmatpush3.bf16.msra.mxu0 %v1778_v9  ;;  %v1795_v26 = vld [vmem:[%s2364_s1 + $0xf0] sm:$0xff]   ;;  %v1799_v30 = vld [vmem:[%s2364_s1 + $0xf8] sm:$0xff]   ;;  %v1808_v37 = vld [vmem:[%s2364_s1 + $0x100] sm:$0xff]  }
   0xc   :  { %1539 = vmatprep.subr.bf16.mxu0 %v1781_v12  ;;  %v1796_v27 = vld [vmem:[%s2364_s1 + $0xb0] sm:$0xff]   ;;  %v1803_v33 = vld [vmem:[%s2364_s1 + $0xb8] sm:$0xff]   ;;  %v1809_v38 = vld [vmem:[%s2364_s1 + $0x1c0] sm:$0xff]  }
   0xd   :  { %1578 = vmatpush3.bf16.msra.mxu1 %v1780_v11  ;;  %v1802_v32 = vld [vmem:[%s2365_s0 + $0x4] ss:$44 sps:$4 sm:$0xff]   ;;  %v1805_v35 = vld [vmem:[%s2365_s0 + $0x8] ss:$44 sps:$4 sm:$0xff]   ;;  %v1807_v36 = vld [vmem:[%s2365_s0 + $0xc] ss:$44 sps:$4 sm:$0xff]  }
   0xe   :  { %1579 = vmatprep.subr.bf16.mxu1 %v1783_v14  ;;  %1030 = vmatprep.mubr.bf16.mxu0 %v1802_v32  ;;  %v1810_v39 = vld [vmem:[%s2364_s1 + $0x180] sm:$0xff]   ;;  %v1811_v40 = vld [vmem:[%s2364_s1 + $0x148] sm:$0xff]   ;;  %v1818_v46 = vld [vmem:[%s2364_s1 + $0x150] sm:$0xff]  }
   0xf   :  { %1540 = vmatpush3.bf16.msra.mxu0 %v1782_v13  ;;  %1095 = vmatprep.mubr.bf16.mxu1 %v1807_v36  ;;  %v1812_v41 = vld [vmem:[%s2364_s1 + $0x108] sm:$0xff]   ;;  %v1817_v45 = vld [vmem:[%s2365_s0 + $0x58] ss:$44 sps:$4 sm:$0xff]   ;;  %v1821_v48 = vld [vmem:[%s2364_s1 + $0x110] sm:$0xff]  }
  0x10   :  { %1541 = vmatprep.subr.bf16.mxu0 %v1785_v16  ;;  %v1813_v42 = vld [vmem:[%s2364_s1 + $0x1c8] sm:$0xff]   ;;  %v1819_v47 = vld [vmem:[%s2365_s0 + $0x64] ss:$44 sps:$4 sm:$0xff]   ;;  %v1825_v52 = vld [vmem:[%s2364_s1 + $0x158] sm:$0xff]  }
  0x11   :  { %1580 = vmatpush3.bf16.msra.mxu1 %v1784_v15  ;;  %v1814_v43 = vld [vmem:[%s2365_s0 + $0x5c] ss:$44 sps:$4 sm:$0xff]   ;;  %v1822_v49 = vld [vmem:[%s2365_s0 + $0x60] ss:$44 sps:$4 sm:$0xff]   ;;  %v1823_v50 = vld [vmem:[%s2364_s1 + $0x1d0] sm:$0xff]  }
  0x12   :  { %1581 = vmatprep.subr.bf16.mxu1 %v1787_v18  ;;  %v1816_v44 = vld [vmem:[%s2364_s1 + $0x188] sm:$0xff]   ;;  %v1824_v51 = vld [vmem:[%s2364_s1 + $0x190] sm:$0xff]   ;;  %v1826_v53 = vld [vmem:[%s2364_s1 + $0x118] sm:$0xff]  }
  0x13   :  { %1542 = vmatpush3.bf16.msra.mxu0 %v1786_v17  ;;  %v1827_v54 = vld [vmem:[%s2364_s1 + $0x1d8] sm:$0xff]   ;;  %v1828_v55 = vld [vmem:[%s2365_s0 + $0xb4] ss:$44 sps:$4 sm:$0xff]   ;;  %v1839_v0 = vld [vmem:[%s2364_s1 + $0x168] sm:$0xff]  }
  0x14   :  { %1543 = vmatprep.subr.bf16.mxu0 %v1789_v20  ;;  %v1830_v56 = vld [vmem:[%s2364_s1 + $0x198] sm:$0xff]   ;;  %v1832_v58 = vld [vmem:[%s2364_s1 + $0x160] sm:$0xff]   ;;  %v1840_v1 = vld [vmem:[%s2364_s1 + $0x128] sm:$0xff]  }
  0x15   :  { %1582 = vmatpush3.bf16.msra.mxu1 %v1788_v19  ;;  %v1831_v57 = vld [vmem:[%s2365_s0 + $0xb0] ss:$44 sps:$4 sm:$0xff]   ;;  %v1835_v60 = vld [vmem:[%s2364_s1 + $0x120] sm:$0xff]   ;;  %v1841_v2 = vld [vmem:[%s2364_s1 + $0x1e8] sm:$0xff]  }
  0x16   :  { %1583 = vmatprep.subr.bf16.mxu1 %v1791_v22  ;;  %v1833_v59 = vld [vmem:[%s2365_s0 + $0xbc] ss:$44 sps:$4 sm:$0xff]   ;;  %v1836_v61 = vld [vmem:[%s2365_s0 + $0xb8] ss:$44 sps:$4 sm:$0xff]   ;;  %v1846_v6 = vld [vmem:[%s2364_s1 + $0x170] sm:$0xff]  }
  0x17   :  { %1544 = vmatpush3.bf16.msra.mxu0 %v1790_v21  ;;  %v1837_v62 = vld [vmem:[%s2364_s1 + $0x1e0] sm:$0xff]   ;;  %v1842_v3 = vld [vmem:[%s2365_s0 + $0x10c] ss:$44 sps:$4 sm:$0xff]   ;;  %v1845_v5 = vld [vmem:[%s2365_s0 + $0x108] ss:$44 sps:$4 sm:$0xff]  }
  0x18   :  { %1545 = vmatprep.subr.bf16.mxu0 %v1793_v24  ;;  %v1838_v63 = vld [vmem:[%s2364_s1 + $0x1a0] sm:$0xff]   ;;  %v1844_v4 = vld [vmem:[%s2364_s1 + $0x1a8] sm:$0xff]   ;;  %v1849_v8 = vld [vmem:[%s2364_s1 + $0x130] sm:$0xff]  }
  0x19   :  { %1584 = vmatpush3.bf16.msra.mxu1 %v1792_v23  ;;  %v1847_v7 = vld [vmem:[%s2365_s0 + $0x114] ss:$44 sps:$4 sm:$0xff]   ;;  %v1850_v9 = vld [vmem:[%s2365_s0 + $0x110] ss:$44 sps:$4 sm:$0xff]   ;;  %v1861_v19 = vld [vmem:[%s2365_s0 + $0x18] ss:$44 sps:$4 sm:$0xff]  }
  0x1a   :  { %1585 = vmatprep.subr.bf16.mxu1 %v1795_v26  ;;  %v1851_v10 = vld [vmem:[%s2364_s1 + $0x1f0] sm:$0xff]   ;;  %v1853_v12 = vld [vmem:[%s2364_s1 + $0x178] sm:$0xff]   ;;  %v1860_v18 = vld [vmem:[%s2364_s1 + $0x240] sm:$0xff]  }
  0x1b   :  { %1546 = vmatpush3.bf16.msra.mxu0 %v1794_v25  ;;  %v1852_v11 = vld [vmem:[%s2364_s1 + $0x1b0] sm:$0xff]   ;;  %v1854_v13 = vld [vmem:[%s2364_s1 + $0x138] sm:$0xff]   ;;  %v1864_v21 = vld [vmem:[%s2364_s1 + $0x200] sm:$0xff]  }
  0x1c   :  { %1547 = vmatprep.subr.bf16.mxu0 %v1797_v28  ;;  %v1855_v14 = vld [vmem:[%s2364_s1 + $0x1f8] sm:$0xff]   ;;  %v1858_v16 = vld [vmem:[%s2365_s0 + $0x14] ss:$44 sps:$4 sm:$0xff]   ;;  %v1865_v22 = vld [vmem:[%s2364_s1 + $0x248] sm:$0xff]  }
  0x1d   :  { %1586 = vmatpush3.bf16.msra.mxu1 %v1796_v27  ;;  %v1856_v15 = vld [vmem:[%s2365_s0 + $0x10] ss:$44 sps:$4 sm:$0xff]   ;;  %v1866_v23 = vld [vmem:[%s2364_s1 + $0x280] sm:$0xff]   ;;  %v1867_v24 = vld [vmem:[%s2364_s1 + $0x208] sm:$0xff]  }
  0x1e   :  { %1587 = vmatprep.subr.bf16.mxu1 %v1799_v30  ;;  %v1859_v17 = vld [vmem:[%s2364_s1 + $0x1b8] sm:$0xff]   ;;  %v1870_v26 = vld [vmem:[%s2365_s0 + $0x68] ss:$44 sps:$4 sm:$0xff]   ;;  %v1882_v36 = vld [vmem:[%s2365_s0 + $0xc0] ss:$44 sps:$4 sm:$0xff]  }
  0x1f   :  { %1548 = vmatpush3.bf16.msra.mxu0 %v1798_v29  ;;  %v1863_v20 = vld [vmem:[%s2365_s0 + $0x1c] ss:$44 sps:$4 sm:$0xff]   ;;  %v1868_v25 = vld [vmem:[%s2365_s0 + $0x6c] ss:$44 sps:$4 sm:$0xff]   ;;  %v1871_v27 = vld [vmem:[%s2364_s1 + $0x250] sm:$0xff]  }
  0x20   :  { %1613 = vmatprep.subr.bf16.mxu0 %v1804_v34  ;;  %v1872_v28 = vld [vmem:[%s2364_s1 + $0x288] sm:$0xff]   ;;  %v1873_v29 = vld [vmem:[%s2365_s0 + $0x74] ss:$44 sps:$4 sm:$0xff]   ;;  %v1877_v32 = vld [vmem:[%s2364_s1 + $0x258] sm:$0xff]  }
  0x21   :  { %1588 = vmatpush3.bf16.msra.mxu1 %v1803_v33  ;;  %v1875_v30 = vld [vmem:[%s2364_s1 + $0x210] sm:$0xff]   ;;  %v1879_v34 = vld [vmem:[%s2364_s1 + $0x218] sm:$0xff]  }
  0x22   :  { %1031 = vmatmul.mubr.bf16.vlgmr.msra.gmra.mrb[0].mxu0 %v1800_v31  ;;  %1653 = vmatprep.subr.bf16.mxu1 %v1809_v38  ;;  %v1876_v31 = vld [vmem:[%s2365_s0 + $0x70] ss:$44 sps:$4 sm:$0xff]  }
  0x23   :  { %1614 = vmatpush3.bf16.msra.mxu0 %v1808_v37  ;;  %1038 = vmatprep.mubr.bf16.mxu0 %v1814_v43  ;;  %v1878_v33 = vld [vmem:[%s2364_s1 + $0x290] sm:$0xff]   ;;  %v1883_v37 = vld [vmem:[%s2364_s1 + $0x260] sm:$0xff]   ;;  %v1884_v38 = vld [vmem:[%s2364_s1 + $0x298] sm:$0xff]  }
  0x24   :  { %1096 = vmatmul.mubr.bf16.vlgmr.msra.gmra.mrb[0].mxu1 %v1805_v35  ;;  %1615 = vmatprep.subr.bf16.mxu0 %v1811_v40  ;;  %v1880_v35 = vld [vmem:[%s2365_s0 + $0xc4] ss:$44 sps:$4 sm:$0xff]  }
  0x25   :  { %1654 = vmatpush3.bf16.msra.mxu1 %v1810_v39  ;;  %1103 = vmatprep.mubr.bf16.mxu1 %v1819_v47  ;;  %v1885_v39 = vld [vmem:[%s2365_s0 + $0xcc] ss:$44 sps:$4 sm:$0xff]   ;;  %v1887_v40 = vld [vmem:[%s2364_s1 + $0x220] sm:$0xff]   ;;  %v1895_v47 = vld [vmem:[%s2364_s1 + $0x270] sm:$0xff]  }
  0x26   :  { %1655 = vmatprep.subr.bf16.mxu1 %v1813_v42  ;;  %v1889_v42 = vld [vmem:[%s2364_s1 + $0x268] sm:$0xff]   ;;  %v1890_v43 = vld [vmem:[%s2364_s1 + $0x2a0] sm:$0xff]  }
  0x27   :  { %1616 = vmatpush3.bf16.msra.mxu0 %v1812_v41  ;;  %v1888_v41 = vld [vmem:[%s2365_s0 + $0xc8] ss:$44 sps:$4 sm:$0xff]  }
  0x28   :  { %1617 = vmatprep.subr.bf16.mxu0 %v1818_v46  ;;  %v1894_v46 = vld [vmem:[%s2365_s0 + $0x118] ss:$44 sps:$4 sm:$0xff]  }
  0x29   :  { %1656 = vmatpush3.bf16.msra.mxu1 %v1816_v44  ;;  %v1891_v44 = vld [vmem:[%s2364_s1 + $0x228] sm:$0xff]  }
  0x2a   :  { %1039 = vmatmul.mubr.bf16.gmra.mrb[4].mxu0 %v1817_v45  ;;  %1657 = vmatprep.subr.bf16.mxu1 %v1823_v50  ;;  %v1892_v45 = vld [vmem:[%s2365_s0 + $0x11c] ss:$44 sps:$4 sm:$0xff]   ;;  %v1899_v50 = vld [vmem:[%s2364_s1 + $0x230] sm:$0xff]  }
  0x2b   :  { %1618 = vmatpush3.bf16.msra.mxu0 %v1821_v48  ;;  %1046 = vmatprep.mubr.bf16.mxu0 %v1828_v55  ;;  %v1896_v48 = vld [vmem:[%s2364_s1 + $0x2a8] sm:$0xff]  }
  0x2c   :  { %1104 = vmatmul.mubr.bf16.gmra.mrb[4].mxu1 %v1822_v49  ;;  %1619 = vmatprep.subr.bf16.mxu0 %v1825_v52  ;;  %v1897_v49 = vld [vmem:[%s2365_s0 + $0x124] ss:$44 sps:$4 sm:$0xff]   ;;  %v1901_v52 = vld [vmem:[%s2364_s1 + $0x278] sm:$0xff]   ;;  %v1904_v55 = vld [vmem:[%s2365_s0 + $0x20] ss:$44 sps:$4 sm:$0xff]  }
  0x2d   :  { %1658 = vmatpush3.bf16.msra.mxu1 %v1824_v51  ;;  %1111 = vmatprep.mubr.bf16.mxu1 %v1833_v59  ;;  %v1900_v51 = vld [vmem:[%s2365_s0 + $0x120] ss:$44 sps:$4 sm:$0xff]  }
  0x2e   :  { %1659 = vmatprep.subr.bf16.mxu1 %v1827_v54  ;;  %v1903_v54 = vld [vmem:[%s2364_s1 + $0x238] sm:$0xff]   ;;  %v1909_v59 = vld [vmem:[%s2365_s0 + $0x80] ss:$44 sps:$4 sm:$0xff]  }
  0x2f   :  { %1620 = vmatpush3.bf16.msra.mxu0 %v1826_v53  ;;  %v1902_v53 = vld [vmem:[%s2364_s1 + $0x2b0] sm:$0xff]  }
  0x30   :  { %1621 = vmatprep.subr.bf16.mxu0 %v1832_v58  ;;  %v1908_v58 = vld [vmem:[%s2365_s0 + $0x28] ss:$44 sps:$4 sm:$0xff]  }
  0x31   :  { %1660 = vmatpush3.bf16.msra.mxu1 %v1830_v56  ;;  %v1906_v56 = vld [vmem:[%s2365_s0 + $0x24] ss:$44 sps:$4 sm:$0xff]  }
  0x32   :  { %1047 = vmatmul.mubr.bf16.gmra.mrb[8].mxu0 %v1831_v57  ;;  %1661 = vmatprep.subr.bf16.mxu1 %v1837_v62  ;;  %v1907_v57 = vld [vmem:[%s2364_s1 + $0x2b8] sm:$0xff]  }
  0x33   :  { %1622 = vmatpush3.bf16.msra.mxu0 %v1835_v60  ;;  %1054 = vmatprep.mubr.bf16.mxu0 %v1842_v3  ;;  %v1910_v60 = vld [vmem:[%s2365_s0 + $0x7c] ss:$44 sps:$4 sm:$0xff]   ;;  %v1912_v62 = vld [vmem:[%s2365_s0 + $0x78] ss:$44 sps:$4 sm:$0xff]  }
  0x34   :  { %1112 = vmatmul.mubr.bf16.gmra.mrb[8].mxu1 %v1836_v61  ;;  %1623 = vmatprep.subr.bf16.mxu0 %v1839_v0  ;;  %v1916_v61 = vld [vmem:[%s2365_s0 + $0xd8] ss:$44 sps:$4 sm:$0xff]   ;;  %v1917_v0 = vld [vmem:[%s2365_s0 + $0x130] ss:$44 sps:$4 sm:$0xff]   ;;  %v1920_v3 = vld [vmem:[%s2365_s0 + $0x128] ss:$44 sps:$4 sm:$0xff]  }
  0x35   :  { %1662 = vmatpush3.bf16.msra.mxu1 %v1838_v63  ;;  %1119 = vmatprep.mubr.bf16.mxu1 %v1847_v7  ;;  %v1913_v63 = vld [vmem:[%s2365_s0 + $0xd4] ss:$44 sps:$4 sm:$0xff]  }
  0x36   :  { %1663 = vmatprep.subr.bf16.mxu1 %v1841_v2  ;;  %v1918_v2 = vld [vmem:[%s2365_s0 + $0x12c] ss:$44 sps:$4 sm:$0xff]  }
  0x37   :  { %1624 = vmatpush3.bf16.msra.mxu0 %v1840_v1  ;;  %v1915_v1 = vld [vmem:[%s2365_s0 + $0xd0] ss:$44 sps:$4 sm:$0xff]  }
  0x38   :  { %1625 = vmatprep.subr.bf16.mxu0 %v1846_v6 }
  0x39   :  { %1664 = vmatpush3.bf16.msra.mxu1 %v1844_v4 }
  0x3a   :  { %1055 = vmatmul.mubr.bf16.gmra.mrb[12].mxu0 %v1845_v5  ;;  %1665 = vmatprep.subr.bf16.mxu1 %v1851_v10  ;;  %v1400_v5 = vld [vmem:[%s2366_s2] ss:$0 sm:$0xff] }
  0x3b   :  { %1626 = vmatpush3.bf16.msra.mxu0 %v1849_v8  ;;  %1160 = vmatprep.mubr.bf16.mxu0 %v1858_v16 }
  0x3c   :  { %1120 = vmatmul.mubr.bf16.gmra.mrb[12].mxu1 %v1850_v9  ;;  %1627 = vmatprep.subr.bf16.mxu0 %v1853_v12 }
  0x3d   :  { %1666 = vmatpush3.bf16.msra.mxu1 %v1852_v11  ;;  %1225 = vmatprep.mubr.bf16.mxu1 %v1863_v20 }
  0x3e   :  { %1667 = vmatprep.subr.bf16.mxu1 %v1855_v14 }
  0x3f   :  { %1628 = vmatpush3.bf16.msra.mxu0 %v1854_v13 }
  0x40   :  { %1693 = vmatprep.subr.bf16.mxu0 %v1860_v18 }
  0x41   :  { %1668 = vmatpush3.bf16.msra.mxu1 %v1859_v17 }
  0x42   :  { %1161 = vmatmul.mubr.bf16.vlgmr.msra.gmra.mrb[16].mxu0 %v1856_v15  ;;  %1745 = vmatprep.subr.bf16.mxu1 %v1866_v23 }
  0x43   :  { %1694 = vmatpush3.bf16.msra.mxu0 %v1864_v21  ;;  %1168 = vmatprep.mubr.bf16.mxu0 %v1868_v25 }
  0x44   :  { %1226 = vmatmul.mubr.bf16.vlgmr.msra.gmra.mrb[16].mxu1 %v1861_v19  ;;  %1695 = vmatprep.subr.bf16.mxu0 %v1865_v22 }
  0x45   :  { %1746 = vmatpush3.bf16.msra.mxu1 %v1866_v23  ;;  %1233 = vmatprep.mubr.bf16.mxu1 %v1873_v29 }
  0x46   :  { %1747 = vmatprep.subr.bf16.mxu1 %v1872_v28 }
  0x47   :  { %1696 = vmatpush3.bf16.msra.mxu0 %v1867_v24 }
  0x48   :  { %1697 = vmatprep.subr.bf16.mxu0 %v1871_v27 }
  0x49   :  { %1748 = vmatpush3.bf16.msra.mxu1 %v1872_v28 }
  0x4a   :  { %1169 = vmatmul.mubr.bf16.gmra.mrb[20].mxu0 %v1870_v26  ;;  %1749 = vmatprep.subr.bf16.mxu1 %v1878_v33 }
  0x4b   :  { %1698 = vmatpush3.bf16.msra.mxu0 %v1875_v30  ;;  %1176 = vmatprep.mubr.bf16.mxu0 %v1880_v35 }
  0x4c   :  { %1234 = vmatmul.mubr.bf16.gmra.mrb[20].mxu1 %v1876_v31  ;;  %1699 = vmatprep.subr.bf16.mxu0 %v1877_v32 }
  0x4d   :  { %1750 = vmatpush3.bf16.msra.mxu1 %v1878_v33  ;;  %1241 = vmatprep.mubr.bf16.mxu1 %v1885_v39 }
  0x4e   :  { %1751 = vmatprep.subr.bf16.mxu1 %v1884_v38 }
  0x4f   :  { %1700 = vmatpush3.bf16.msra.mxu0 %v1879_v34 }
  0x50   :  { %1701 = vmatprep.subr.bf16.mxu0 %v1883_v37 }
  0x51   :  { %1752 = vmatpush3.bf16.msra.mxu1 %v1884_v38 }
  0x52   :  { %1177 = vmatmul.mubr.bf16.gmra.mrb[24].mxu0 %v1882_v36  ;;  %1753 = vmatprep.subr.bf16.mxu1 %v1890_v43 }
  0x53   :  { %1702 = vmatpush3.bf16.msra.mxu0 %v1887_v40  ;;  %1184 = vmatprep.mubr.bf16.mxu0 %v1892_v45 }
  0x54   :  { %1242 = vmatmul.mubr.bf16.gmra.mrb[24].mxu1 %v1888_v41  ;;  %1703 = vmatprep.subr.bf16.mxu0 %v1889_v42 }
  0x55   :  { %1754 = vmatpush3.bf16.msra.mxu1 %v1890_v43  ;;  %1249 = vmatprep.mubr.bf16.mxu1 %v1897_v49 }
  0x56   :  { %1755 = vmatprep.subr.bf16.mxu1 %v1896_v48 }
  0x57   :  { %1704 = vmatpush3.bf16.msra.mxu0 %v1891_v44 }
  0x58   :  { %1705 = vmatprep.subr.bf16.mxu0 %v1895_v47 }
  0x59   :  { %1756 = vmatpush3.bf16.msra.mxu1 %v1896_v48 }
  0x5a   :  { %1185 = vmatmul.mubr.bf16.gmra.mrb[28].mxu0 %v1894_v46  ;;  %1757 = vmatprep.subr.bf16.mxu1 %v1902_v53 }
  0x5b   :  { %1706 = vmatpush3.bf16.msra.mxu0 %v1899_v50  ;;  %1290 = vmatprep.mubr.bf16.mxu0 %v1906_v56 }
  0x5c   :  { %1250 = vmatmul.mubr.bf16.gmra.mrb[28].mxu1 %v1900_v51  ;;  %1707 = vmatprep.subr.bf16.mxu0 %v1901_v52 }
  0x5d   :  { %1758 = vmatpush3.bf16.msra.mxu1 %v1902_v53  ;;  %1761 = vmatprep.mubr.bf16.mxu1 %v1908_v58 }
  0x5e   :  { %1759 = vmatprep.subr.bf16.mxu1 %v1907_v57 }
  0x5f   :  { %1708 = vmatpush3.bf16.msra.mxu0 %v1903_v54 }
  0x61   :  { %1760 = vmatpush3.bf16.msra.mxu1 %v1907_v57 }
  0x62   :  { %1291 = vmatmul.mubr.bf16.vlgmr.msra.gmra.mrb[32].mxu0 %v1904_v55 }
  0x63   :  { %1298 = vmatprep.mubr.bf16.mxu0 %v1910_v60 }
  0x64   :  { %1762 = vmatmul.mubr.bf16.vlgmr.msra.gmra.mrb[32].mxu1 %v1909_v59 }
  0x65   :  { %1765 = vmatprep.mubr.bf16.mxu1 %v1916_v61 }
  0x6a   :  { %1299 = vmatmul.mubr.bf16.gmra.mrb[36].mxu0 %v1912_v62 }
  0x6b   :  { %1306 = vmatprep.mubr.bf16.mxu0 %v1913_v63 }
  0x6c   :  { %1766 = vmatmul.mubr.bf16.gmra.mrb[36].mxu1 %v1917_v0 }
  0x72   :  { %1307 = vmatmul.mubr.bf16.gmra.mrb[40].mxu0 %v1915_v1 }
  0x73   :  { %1314 = vmatprep.mubr.bf16.mxu0 %v1918_v2 }
  0x7a   :  { %1315 = vmatmul.mubr.bf16.gmra.mrb[44].mxu0 %v1920_v3 }
  0xf5   :  { %v1549_v4 = vpop.f32.mrb[0].mxu0 }
  0xf6   :  { %v1550_v6 = vpop.f32.mrb[1].mxu0 }
  0xf7   :  { %v1551_v7 = vadd.f32 %v1550_v6, %v1549_v4  ;;  %v1552_v8 = vpop.f32.mrb[2].mxu0  ;;  %v1589_v9 = vpop.f32.mrb[0].mxu1 }
  0xf8   :  { %v1553_v10 = vpop.f32.mrb[3].mxu0  ;;  %v1590_v13 = vpop.f32.mrb[1].mxu1 }
  0xf9   :  { %v1033_v11 = vadd.f32 %v1551_v7, %v1400_v5  ;;  %v1554_v12 = vadd.f32 %v1553_v10, %v1552_v8  ;;  %v1591_v14 = vadd.f32 %v1590_v13, %v1589_v9  ;;  %v1592_v15 = vpop.f32.mrb[2].mxu1 }
  0xfa   :  { %v1593_v17 = vpop.f32.mrb[3].mxu1 }
  0xfb   :  { %v1036_v16 = vadd.f32 %v1554_v12, %v1400_v5  ;;  %v1098_v18 = vadd.f32 %v1591_v14, %v1033_v11  ;;  %v1594_v19 = vadd.f32 %v1593_v17, %v1592_v15 }
  0xfd   :  { %v1101_v20 = vadd.f32 %v1594_v19, %v1036_v16  ;;  %v1555_v21 = vpop.f32.mrb[4].mxu0 }
  0xfe   :  { %v1556_v22 = vpop.f32.mrb[5].mxu0 }
  0xff   :  { %v1557_v23 = vadd.f32 %v1556_v22, %v1555_v21  ;;  %v1558_v24 = vpop.f32.mrb[6].mxu0  ;;  %v1595_v27 = vpop.f32.mrb[4].mxu1 }
 0x100   :  { %v1559_v25 = vpop.f32.mrb[7].mxu0  ;;  %v1596_v29 = vpop.f32.mrb[5].mxu1 }
 0x101   :  { %v1041_v26 = vadd.f32 %v1557_v23, %v1400_v5  ;;  %v1560_v28 = vadd.f32 %v1559_v25, %v1558_v24  ;;  %v1597_v31 = vadd.f32 %v1596_v29, %v1595_v27  ;;  %v1598_v32 = vpop.f32.mrb[6].mxu1 }
 0x102   :  { %v1599_v33 = vpop.f32.mrb[7].mxu1 }
 0x103   :  { %v1044_v30 = vadd.f32 %v1560_v28, %v1400_v5  ;;  %v1106_v34 = vadd.f32 %v1597_v31, %v1041_v26  ;;  %v1600_v35 = vadd.f32 %v1599_v33, %v1598_v32 }
 0x105   :  { %v1109_v36 = vadd.f32 %v1600_v35, %v1044_v30  ;;  %v1561_v37 = vpop.f32.mrb[8].mxu0 }
 0x106   :  { %v1562_v38 = vpop.f32.mrb[9].mxu0 }
 0x107   :  { %v1563_v39 = vadd.f32 %v1562_v38, %v1561_v37  ;;  %v1564_v40 = vpop.f32.mrb[10].mxu0  ;;  %v1601_v41 = vpop.f32.mrb[8].mxu1 }
 0x108   :  { %v1565_v42 = vpop.f32.mrb[11].mxu0  ;;  %v1602_v45 = vpop.f32.mrb[9].mxu1 }
 0x109   :  { %v1049_v43 = vadd.f32 %v1563_v39, %v1400_v5  ;;  %v1566_v44 = vadd.f32 %v1565_v42, %v1564_v40  ;;  %v1603_v46 = vadd.f32 %v1602_v45, %v1601_v41  ;;  %v1604_v47 = vpop.f32.mrb[10].mxu1 }
 0x10a   :  { %v1605_v49 = vpop.f32.mrb[11].mxu1 }
 0x10b   :  { %v1052_v48 = vadd.f32 %v1566_v44, %v1400_v5  ;;  %v1114_v50 = vadd.f32 %v1603_v46, %v1049_v43  ;;  %v1606_v51 = vadd.f32 %v1605_v49, %v1604_v47 }
 0x10d   :  { %v1117_v52 = vadd.f32 %v1606_v51, %v1052_v48  ;;  %v1567_v53 = vpop.f32.mrb[12].mxu0 }
 0x10e   :  { %v1568_v54 = vpop.f32.mrb[13].mxu0 }
 0x10f   :  { %v1569_v55 = vadd.f32 %v1568_v54, %v1567_v53  ;;  %v1570_v56 = vpop.f32.mrb[14].mxu0  ;;  %v1607_v57 = vpop.f32.mrb[12].mxu1 }
 0x110   :  { %v1571_v58 = vpop.f32.mrb[15].mxu0  ;;  %v1608_v61 = vpop.f32.mrb[13].mxu1 }
 0x111   :  { %v1057_v59 = vadd.f32 %v1569_v55, %v1400_v5  ;;  %v1572_v60 = vadd.f32 %v1571_v58, %v1570_v56  ;;  %v1609_v62 = vadd.f32 %v1608_v61, %v1607_v57  ;;  %v1610_v63 = vpop.f32.mrb[14].mxu1 }
 0x112   :  { %v1611_v1 = vpop.f32.mrb[15].mxu1 }
 0x113   :  { %v1060_v0 = vadd.f32 %v1572_v60, %v1400_v5  ;;  %v1122_v2 = vadd.f32 %v1609_v62, %v1057_v59  ;;  %v1612_v3 = vadd.f32 %v1611_v1, %v1610_v63 }
 0x115   :  { %v1125_v4 = vadd.f32 %v1612_v3, %v1060_v0  ;;  %v1629_v6 = vpop.f32.mrb[16].mxu0 }
 0x116   :  { %v1630_v7 = vpop.f32.mrb[17].mxu0 }
 0x117   :  { %v1631_v8 = vadd.f32 %v1630_v7, %v1629_v6  ;;  %v1632_v9 = vpop.f32.mrb[18].mxu0  ;;  %v1669_v12 = vpop.f32.mrb[16].mxu1 }
 0x118   :  { %v1633_v10 = vpop.f32.mrb[19].mxu0  ;;  %v1670_v14 = vpop.f32.mrb[17].mxu1 }
 0x119   :  { %v1163_v11 = vadd.f32 %v1631_v8, %v1098_v18  ;;  %v1634_v13 = vadd.f32 %v1633_v10, %v1632_v9  ;;  %v1671_v16 = vadd.f32 %v1670_v14, %v1669_v12  ;;  %v1672_v17 = vpop.f32.mrb[18].mxu1 }
 0x11a   :  { %v1673_v19 = vpop.f32.mrb[19].mxu1 }
 0x11b   :  { %v1166_v15 = vadd.f32 %v1634_v13, %v1101_v20  ;;  %v1228_v21 = vadd.f32 %v1671_v16, %v1163_v11  ;;  %v1674_v22 = vadd.f32 %v1673_v19, %v1672_v17 }
 0x11d   :  { %v1635_v5 = vpop.f32.mrb[20].mxu0  ;;  %v1231_v23 = vadd.f32 %v1674_v22, %v1166_v15 }
 0x11e   :  { %v1636_v24 = vpop.f32.mrb[21].mxu0 }
 0x11f   :  { %v1637_v25 = vadd.f32 %v1636_v24, %v1635_v5  ;;  %v1638_v26 = vpop.f32.mrb[22].mxu0  ;;  %v1675_v27 = vpop.f32.mrb[20].mxu1 }
 0x120   :  { %v1639_v28 = vpop.f32.mrb[23].mxu0  ;;  %v1676_v31 = vpop.f32.mrb[21].mxu1 }
 0x121   :  { %v1171_v29 = vadd.f32 %v1637_v25, %v1106_v34  ;;  %v1640_v30 = vadd.f32 %v1639_v28, %v1638_v26  ;;  %v1677_v18 = vadd.f32 %v1676_v31, %v1675_v27  ;;  %v1678_v32 = vpop.f32.mrb[22].mxu1 }
 0x122   :  { %v1679_v35 = vpop.f32.mrb[23].mxu1 }
 0x123   :  { %v1174_v33 = vadd.f32 %v1640_v30, %v1109_v36  ;;  %v1236_v20 = vadd.f32 %v1677_v18, %v1171_v29  ;;  %v1680_v37 = vadd.f32 %v1679_v35, %v1678_v32 }
 0x125   :  { %v1641_v38 = vpop.f32.mrb[24].mxu0  ;;  %v1239_v39 = vadd.f32 %v1680_v37, %v1174_v33 }
 0x126   :  { %v1642_v40 = vpop.f32.mrb[25].mxu0 }
 0x127   :  { %v1643_v41 = vadd.f32 %v1642_v40, %v1641_v38  ;;  %v1644_v42 = vpop.f32.mrb[26].mxu0  ;;  %v1681_v45 = vpop.f32.mrb[24].mxu1 }
 0x128   :  { %v1645_v43 = vpop.f32.mrb[27].mxu0  ;;  %v1682_v47 = vpop.f32.mrb[25].mxu1 }
 0x129   :  { %v1179_v44 = vadd.f32 %v1643_v41, %v1114_v50  ;;  %v1646_v46 = vadd.f32 %v1645_v43, %v1644_v42  ;;  %v1683_v34 = vadd.f32 %v1682_v47, %v1681_v45  ;;  %v1684_v49 = vpop.f32.mrb[26].mxu1 }
 0x12a   :  { %v1685_v51 = vpop.f32.mrb[27].mxu1 }
 0x12b   :  { %v1182_v48 = vadd.f32 %v1646_v46, %v1117_v52  ;;  %v1244_v53 = vadd.f32 %v1683_v34, %v1179_v44  ;;  %v1686_v54 = vadd.f32 %v1685_v51, %v1684_v49 }
 0x12d   :  { %v1647_v36 = vpop.f32.mrb[28].mxu0  ;;  %v1247_v55 = vadd.f32 %v1686_v54, %v1182_v48 }
 0x12e   :  { %v1648_v56 = vpop.f32.mrb[29].mxu0 }
 0x12f   :  { %v1649_v57 = vadd.f32 %v1648_v56, %v1647_v36  ;;  %v1650_v58 = vpop.f32.mrb[30].mxu0  ;;  %v1687_v61 = vpop.f32.mrb[28].mxu1 }
 0x130   :  { %v1651_v59 = vpop.f32.mrb[31].mxu0  ;;  %v1688_v63 = vpop.f32.mrb[29].mxu1 }
 0x131   :  { %v1187_v60 = vadd.f32 %v1649_v57, %v1122_v2  ;;  %v1652_v62 = vadd.f32 %v1651_v59, %v1650_v58  ;;  %v1689_v0 = vadd.f32 %v1688_v63, %v1687_v61  ;;  %v1690_v1 = vpop.f32.mrb[30].mxu1 }
 0x132   :  { %v1691_v3 = vpop.f32.mrb[31].mxu1 }
 0x133   :  { %v1190_v50 = vadd.f32 %v1652_v62, %v1125_v4  ;;  %v1252_v52 = vadd.f32 %v1689_v0, %v1187_v60  ;;  %v1692_v6 = vadd.f32 %v1691_v3, %v1690_v1 }
 0x135   :  { %v1255_v7 = vadd.f32 %v1692_v6, %v1190_v50  ;;  %v1709_v8 = vpop.f32.mrb[32].mxu0 }
 0x136   :  { %v1710_v9 = vpop.f32.mrb[33].mxu0 }
 0x137   :  { %v1711_v10 = vadd.f32 %v1710_v9, %v1709_v8  ;;  %v1712_v11 = vpop.f32.mrb[34].mxu0  ;;  %v1763_v14 = vpop.f32.mrb[32].mxu1 }
 0x138   :  { %v1713_v12 = vpop.f32.mrb[35].mxu0  ;;  %v1357_v16 = vpop.f32.mrb[33].mxu1 }
 0x139   :  { %v1714_v13 = vadd.f32 %v1713_v12, %v1712_v11  ;;  %v1293_v15 = vadd.f32 %v1711_v10, %v1228_v21  ;;  %v1764_v17 = vpop.f32.mrb[34].mxu1 }
 0x13a   :  { %v1360_v22 = vpop.f32.mrb[35].mxu1 }
 0x13b   :  { %v1358_v2 = vadd.f32 %v1357_v16, %v1293_v15  ;;  %v1296_v19 = vadd.f32 %v1714_v13, %v1231_v23 }
 0x13d   :  { %1388 = vst [vmem:[%s2367_s3] sm:$0xff] %v1358_v2  ;;  %v1361_v4 = vadd.f32 %v1360_v22, %v1296_v19  ;;  %v1715_v5 = vpop.f32.mrb[36].mxu0 }
 0x13e   :  { %v1716_v24 = vpop.f32.mrb[37].mxu0 }
 0x13f   :  { %1389 = vst [vmem:[%s2367_s3 + $0x8] sm:$0xff] %v1361_v4  ;;  %v1717_v25 = vadd.f32 %v1716_v24, %v1715_v5  ;;  %v1718_v26 = vpop.f32.mrb[38].mxu0  ;;  %v1767_v29 = vpop.f32.mrb[36].mxu1 }
 0x140   :  { %v1719_v27 = vpop.f32.mrb[39].mxu0  ;;  %v1373_v30 = vpop.f32.mrb[37].mxu1 }
 0x141   :  { %v1301_v21 = vadd.f32 %v1717_v25, %v1236_v20  ;;  %v1720_v28 = vadd.f32 %v1719_v27, %v1718_v26  ;;  %v1768_v18 = vpop.f32.mrb[38].mxu1 }
 0x142   :  { %v1376_v32 = vpop.f32.mrb[39].mxu1 }
 0x143   :  { %v1366_v23 = vadd.f32 %v1763_v14, %v1301_v21  ;;  %v1304_v31 = vadd.f32 %v1720_v28, %v1239_v39 }
 0x145   :  { %1390 = vst [vmem:[%s2367_s3 + $0x10] sm:$0xff] %v1366_v23  ;;  %v1369_v33 = vadd.f32 %v1764_v17, %v1304_v31  ;;  %v1721_v35 = vpop.f32.mrb[40].mxu0 }
 0x146   :  { %v1722_v37 = vpop.f32.mrb[41].mxu0 }
 0x147   :  { %1391 = vst [vmem:[%s2367_s3 + $0x18] sm:$0xff] %v1369_v33  ;;  %v1723_v38 = vadd.f32 %v1722_v37, %v1721_v35  ;;  %v1724_v20 = vpop.f32.mrb[42].mxu0 }
 0x148   :  { %v1725_v40 = vpop.f32.mrb[43].mxu0 }
 0x149   :  { %v1726_v41 = vadd.f32 %v1725_v40, %v1724_v20  ;;  %v1309_v42 = vadd.f32 %v1723_v38, %v1244_v53 }
 0x14b   :  { %v1374_v43 = vadd.f32 %v1373_v30, %v1309_v42  ;;  %v1312_v39 = vadd.f32 %v1726_v41, %v1247_v55 }
 0x14d   :  { %1392 = vst [vmem:[%s2367_s3 + $0x20] sm:$0xff] %v1374_v43  ;;  %v1377_v44 = vadd.f32 %v1376_v32, %v1312_v39  ;;  %v1727_v45 = vpop.f32.mrb[44].mxu0 }
 0x14e   :  { %v1728_v46 = vpop.f32.mrb[45].mxu0 }
 0x14f   :  { %1393 = vst [vmem:[%s2367_s3 + $0x28] sm:$0xff] %v1377_v44  ;;  %v1729_v47 = vadd.f32 %v1728_v46, %v1727_v45  ;;  %v1730_v48 = vpop.f32.mrb[46].mxu0 }
 0x150   :  { %v1731_v34 = vpop.f32.mrb[47].mxu0 }
 0x151   :  { %v1317_v49 = vadd.f32 %v1729_v47, %v1252_v52  ;;  %v1732_v51 = vadd.f32 %v1731_v34, %v1730_v48 }
 0x153   :  { %v1382_v54 = vadd.f32 %v1767_v29, %v1317_v49  ;;  %v1320_v53 = vadd.f32 %v1732_v51, %v1255_v7 }
 0x155   :  { %1394 = vst [vmem:[%s2367_s3 + $0x30] sm:$0xff] %v1382_v54  ;;  %v1385_v36 = vadd.f32 %v1768_v18, %v1320_v53 }
 0x157   :  { %1395 = vst [vmem:[%s2367_s3 + $0x38] sm:$0xff] %v1385_v36 }

// kernel: bottleneck_forward.4
= control target key start
LH: loop header
LB: loop body
LE: loop exit
PB: predicated region body
PF: predicated region fallthrough
CT: control target
= control target key end

     0   :  { %s2330_s1 = inlined_call_operand.vmem [shape: bf16[896,128], index: 1, kind: input, shape index: {}]   ;;  %s2331_s0 = inlined_call_operand.vmem [shape: bf16[128,896], index: 0, kind: input, shape index: {}]   ;;  %s2332_s2 = inlined_call_operand.vmem [shape: f32[1,128], index: 2, kind: input, shape index: {}]   ;;  %s2333_s3 = inlined_call_operand.vmem [shape: bf16[128,128], index: 3, kind: output, shape index: {}]  }
   0x1   :  { %v1742_v0 = vld [vmem:[%s2330_s1 + $0x40] sm:$0xff]   ;;  %v1746_v4 = vld [vmem:[%s2330_s1 + $0x48] sm:$0xff]   ;;  %v1750_v8 = vld [vmem:[%s2330_s1 + $0x50] sm:$0xff]  }
   0x2   :  { %v1743_v1 = vld [vmem:[%s2330_s1] sm:$0xff]   ;;  %1502 = vmatprep.subr.bf16.mxu0 %v1742_v0  ;;  %v1747_v5 = vld [vmem:[%s2330_s1 + $0x8] sm:$0xff]   ;;  %v1751_v9 = vld [vmem:[%s2330_s1 + $0x10] sm:$0xff]  }
   0x3   :  { %v1744_v2 = vld [vmem:[%s2330_s1 + $0xc0] sm:$0xff]   ;;  %1503 = vmatpush3.bf16.msra.mxu0 %v1743_v1  ;;  %v1748_v6 = vld [vmem:[%s2330_s1 + $0xc8] sm:$0xff]   ;;  %v1752_v10 = vld [vmem:[%s2330_s1 + $0xd0] sm:$0xff]  }
   0x4   :  { %v1745_v3 = vld [vmem:[%s2330_s1 + $0x80] sm:$0xff]   ;;  %1566 = vmatprep.subr.bf16.mxu1 %v1744_v2  ;;  %1504 = vmatprep.subr.bf16.mxu0 %v1746_v4  ;;  %v1749_v7 = vld [vmem:[%s2330_s1 + $0x88] sm:$0xff]   ;;  %v1753_v11 = vld [vmem:[%s2330_s1 + $0x90] sm:$0xff]  }
   0x5   :  { %1567 = vmatpush3.bf16.msra.mxu1 %v1745_v3  ;;  %v1754_v12 = vld [vmem:[%s2330_s1 + $0x58] sm:$0xff]   ;;  %v1758_v16 = vld [vmem:[%s2330_s1 + $0x60] sm:$0xff]   ;;  %v1762_v20 = vld [vmem:[%s2330_s1 + $0x68] sm:$0xff]  }
   0x6   :  { %1568 = vmatprep.subr.bf16.mxu1 %v1748_v6  ;;  %v1755_v13 = vld [vmem:[%s2330_s1 + $0x18] sm:$0xff]   ;;  %v1759_v17 = vld [vmem:[%s2330_s1 + $0x20] sm:$0xff]   ;;  %v1763_v21 = vld [vmem:[%s2330_s1 + $0x28] sm:$0xff]  }
   0x7   :  { %1505 = vmatpush3.bf16.msra.mxu0 %v1747_v5  ;;  %v1756_v14 = vld [vmem:[%s2330_s1 + $0xd8] sm:$0xff]   ;;  %v1760_v18 = vld [vmem:[%s2330_s1 + $0xe0] sm:$0xff]   ;;  %v1764_v22 = vld [vmem:[%s2330_s1 + $0xe8] sm:$0xff]  }
   0x8   :  { %1506 = vmatprep.subr.bf16.mxu0 %v1750_v8  ;;  %v1757_v15 = vld [vmem:[%s2330_s1 + $0x98] sm:$0xff]   ;;  %v1761_v19 = vld [vmem:[%s2330_s1 + $0xa0] sm:$0xff]   ;;  %v1765_v23 = vld [vmem:[%s2330_s1 + $0xa8] sm:$0xff]  }
   0x9   :  { %1569 = vmatpush3.bf16.msra.mxu1 %v1749_v7  ;;  %v1766_v24 = vld [vmem:[%s2330_s1 + $0x70] sm:$0xff]   ;;  %v1770_v28 = vld [vmem:[%s2330_s1 + $0x78] sm:$0xff]   ;;  %v1775_v32 = vld [vmem:[%s2331_s0 + $0x4] ss:$28 sps:$4 sm:$0xff]  }
   0xa   :  { %1570 = vmatprep.subr.bf16.mxu1 %v1752_v10  ;;  %v1767_v25 = vld [vmem:[%s2330_s1 + $0x30] sm:$0xff]   ;;  %v1771_v29 = vld [vmem:[%s2330_s1 + $0x38] sm:$0xff]   ;;  %854 = vmatprep.mubr.bf16.mxu0 %v1775_v32  ;;  %v1777_v34 = vld [vmem:[%s2330_s1 + $0x140] sm:$0xff]  }
   0xb   :  { %1507 = vmatpush3.bf16.msra.mxu0 %v1751_v9  ;;  %v1768_v26 = vld [vmem:[%s2330_s1 + $0xf0] sm:$0xff]   ;;  %v1772_v30 = vld [vmem:[%s2330_s1 + $0xf8] sm:$0xff]   ;;  %v1778_v35 = vld [vmem:[%s2331_s0 + $0x8] ss:$28 sps:$4 sm:$0xff]  }
   0xc   :  { %1508 = vmatprep.subr.bf16.mxu0 %v1754_v12  ;;  %v1769_v27 = vld [vmem:[%s2330_s1 + $0xb0] sm:$0xff]   ;;  %v1773_v31 = vld [vmem:[%s2331_s0] ss:$28 sps:$4 sm:$0xff]   ;;  %v1780_v36 = vld [vmem:[%s2331_s0 + $0xc] ss:$28 sps:$4 sm:$0xff]  }
   0xd   :  { %1571 = vmatpush3.bf16.msra.mxu1 %v1753_v11  ;;  %v1776_v33 = vld [vmem:[%s2330_s1 + $0xb8] sm:$0xff]   ;;  %v1781_v37 = vld [vmem:[%s2330_s1 + $0x100] sm:$0xff]   ;;  %951 = vmatprep.mubr.bf16.mxu1 %v1780_v36  ;;  %v1785_v40 = vld [vmem:[%s2330_s1 + $0x148] sm:$0xff]  }
   0xe   :  { %1572 = vmatprep.subr.bf16.mxu1 %v1756_v14  ;;  %v1782_v38 = vld [vmem:[%s2331_s0 + $0x3c] ss:$28 sps:$4 sm:$0xff]   ;;  %v1786_v41 = vld [vmem:[%s2331_s0 + $0x44] ss:$28 sps:$4 sm:$0xff]   ;;  %v1788_v42 = vld [vmem:[%s2330_s1 + $0x108] sm:$0xff]  }
   0xf   :  { %1509 = vmatpush3.bf16.msra.mxu0 %v1755_v13  ;;  %v1784_v39 = vld [vmem:[%s2331_s0 + $0x38] ss:$28 sps:$4 sm:$0xff]   ;;  %v1789_v43 = vld [vmem:[%s2331_s0 + $0x40] ss:$28 sps:$4 sm:$0xff]   ;;  %v1792_v48 = vld [vmem:[%s2331_s0 + $0x70] ss:$28 sps:$4 sm:$0xff]  }
  0x10   :  { %1510 = vmatprep.subr.bf16.mxu0 %v1758_v16  ;;  %v1790_v44 = vld [vmem:[%s2331_s0 + $0x74] ss:$28 sps:$4 sm:$0xff]   ;;  %v1794_v46 = vld [vmem:[%s2331_s0 + $0x7c] ss:$28 sps:$4 sm:$0xff]   ;;  %v1798_v49 = vld [vmem:[%s2331_s0 + $0xac] ss:$28 sps:$4 sm:$0xff]  }
  0x11   :  { %1573 = vmatpush3.bf16.msra.mxu1 %v1757_v15  ;;  %v1793_v45 = vld [vmem:[%s2330_s1 + $0x150] sm:$0xff]   ;;  %v1801_v50 = vld [vmem:[%s2330_s1 + $0x158] sm:$0xff]   ;;  %v1809_v54 = vld [vmem:[%s2330_s1 + $0x160] sm:$0xff]  }
  0x12   :  { %1574 = vmatprep.subr.bf16.mxu1 %v1760_v18  ;;  %v1796_v47 = vld [vmem:[%s2330_s1 + $0x110] sm:$0xff]   ;;  %v1804_v52 = vld [vmem:[%s2330_s1 + $0x118] sm:$0xff]   ;;  %v1800_v55 = vld [vmem:[%s2331_s0 + $0xa8] ss:$28 sps:$4 sm:$0xff]  }
  0x13   :  { %1511 = vmatpush3.bf16.msra.mxu0 %v1759_v17  ;;  %v1797_v51 = vld [vmem:[%s2331_s0 + $0x78] ss:$28 sps:$4 sm:$0xff]   ;;  %v1812_v56 = vld [vmem:[%s2330_s1 + $0x120] sm:$0xff]   ;;  %v1805_v59 = vld [vmem:[%s2331_s0 + $0xb0] ss:$28 sps:$4 sm:$0xff]  }
  0x14   :  { %1512 = vmatprep.subr.bf16.mxu0 %v1762_v20  ;;  %v1802_v53 = vld [vmem:[%s2331_s0 + $0xb4] ss:$28 sps:$4 sm:$0xff]   ;;  %v1806_v57 = vld [vmem:[%s2331_s0 + $0xe4] ss:$28 sps:$4 sm:$0xff]   ;;  %v1810_v60 = vld [vmem:[%s2331_s0 + $0xec] ss:$28 sps:$4 sm:$0xff]  }
  0x15   :  { %1575 = vmatpush3.bf16.msra.mxu1 %v1761_v19  ;;  %v1814_v58 = vld [vmem:[%s2330_s1 + $0x180] sm:$0xff]   ;;  %v1818_v61 = vld [vmem:[%s2330_s1 + $0x168] sm:$0xff]   ;;  %v1824_v0 = vld [vmem:[%s2330_s1 + $0x190] sm:$0xff]  }
  0x16   :  { %1576 = vmatprep.subr.bf16.mxu1 %v1764_v22  ;;  %v1819_v62 = vld [vmem:[%s2330_s1 + $0x188] sm:$0xff]   ;;  %v1808_v1 = vld [vmem:[%s2331_s0 + $0xe0] ss:$28 sps:$4 sm:$0xff]   ;;  %v1828_v4 = vld [vmem:[%s2330_s1 + $0x170] sm:$0xff]  }
  0x17   :  { %1513 = vmatpush3.bf16.msra.mxu0 %v1763_v21  ;;  %v1822_v63 = vld [vmem:[%s2330_s1 + $0x128] sm:$0xff]   ;;  %v1815_v3 = vld [vmem:[%s2331_s0 + $0x11c] ss:$28 sps:$4 sm:$0xff]   ;;  %v1820_v6 = vld [vmem:[%s2331_s0 + $0x124] ss:$28 sps:$4 sm:$0xff]  }
  0x18   :  { %1514 = vmatprep.subr.bf16.mxu0 %v1766_v24  ;;  %v1813_v2 = vld [vmem:[%s2331_s0 + $0xe8] ss:$28 sps:$4 sm:$0xff]   ;;  %v1829_v5 = vld [vmem:[%s2330_s1 + $0x198] sm:$0xff]   ;;  %v1832_v7 = vld [vmem:[%s2330_s1 + $0x130] sm:$0xff]  }
  0x19   :  { %1577 = vmatpush3.bf16.msra.mxu1 %v1765_v23  ;;  %v1834_v8 = vld [vmem:[%s2330_s1 + $0x1a0] sm:$0xff]   ;;  %v1817_v9 = vld [vmem:[%s2331_s0 + $0x118] ss:$28 sps:$4 sm:$0xff]   ;;  %v1839_v13 = vld [vmem:[%s2330_s1 + $0x1a8] sm:$0xff]  }
  0x1a   :  { %1578 = vmatprep.subr.bf16.mxu1 %v1768_v26  ;;  %v1838_v10 = vld [vmem:[%s2330_s1 + $0x178] sm:$0xff]   ;;  %v1825_v12 = vld [vmem:[%s2331_s0 + $0x154] ss:$28 sps:$4 sm:$0xff]   ;;  %v1835_v18 = vld [vmem:[%s2331_s0 + $0x18c] ss:$28 sps:$4 sm:$0xff]  }
  0x1b   :  { %1515 = vmatpush3.bf16.msra.mxu0 %v1767_v25  ;;  %v1823_v11 = vld [vmem:[%s2331_s0 + $0x120] ss:$28 sps:$4 sm:$0xff]   ;;  %v1844_v16 = vld [vmem:[%s2330_s1 + $0x1b0] sm:$0xff]   ;;  %v1837_v22 = vld [vmem:[%s2331_s0 + $0x188] ss:$28 sps:$4 sm:$0xff]  }
  0x1c   :  { %1516 = vmatprep.subr.bf16.mxu0 %v1770_v28  ;;  %v1842_v14 = vld [vmem:[%s2330_s1 + $0x138] sm:$0xff]   ;;  %v1827_v17 = vld [vmem:[%s2331_s0 + $0x150] ss:$28 sps:$4 sm:$0xff]  }
  0x1d   :  { %1579 = vmatpush3.bf16.msra.mxu1 %v1769_v27  ;;  %v1830_v15 = vld [vmem:[%s2331_s0 + $0x15c] ss:$28 sps:$4 sm:$0xff]   ;;  %v1840_v21 = vld [vmem:[%s2331_s0 + $0x194] ss:$28 sps:$4 sm:$0xff]   ;;  %v1851_v27 = vld [vmem:[%s2331_s0 + $0x4c] ss:$28 sps:$4 sm:$0xff]  }
  0x1e   :  { %1580 = vmatprep.subr.bf16.mxu1 %v1772_v30  ;;  %v1848_v19 = vld [vmem:[%s2330_s1 + $0x1b8] sm:$0xff]   ;;  %v1847_v23 = vld [vmem:[%s2331_s0 + $0x14] ss:$28 sps:$4 sm:$0xff]   ;;  %v1853_v30 = vld [vmem:[%s2331_s0 + $0x48] ss:$28 sps:$4 sm:$0xff]  }
  0x1f   :  { %1517 = vmatpush3.bf16.msra.mxu0 %v1771_v29  ;;  %v1833_v20 = vld [vmem:[%s2331_s0 + $0x158] ss:$28 sps:$4 sm:$0xff]   ;;  %v1843_v24 = vld [vmem:[%s2331_s0 + $0x190] ss:$28 sps:$4 sm:$0xff]   ;;  %v1857_v29 = vld [vmem:[%s2331_s0 + $0x88] ss:$28 sps:$4 sm:$0xff]  }
  0x20   :  { %1630 = vmatprep.subr.bf16.mxu0 %v1777_v34  ;;  %v1849_v25 = vld [vmem:[%s2331_s0 + $0x18] ss:$28 sps:$4 sm:$0xff]   ;;  %v1845_v26 = vld [vmem:[%s2331_s0 + $0x10] ss:$28 sps:$4 sm:$0xff]   ;;  %v1858_v32 = vld [vmem:[%s2331_s0 + $0xc0] ss:$28 sps:$4 sm:$0xff]  }
  0x21   :  { %1581 = vmatpush3.bf16.msra.mxu1 %v1776_v33  ;;  %v1850_v28 = vld [vmem:[%s2331_s0 + $0x50] ss:$28 sps:$4 sm:$0xff]   ;;  %v1865_v33 = vld [vmem:[%s2331_s0 + $0xf8] ss:$28 sps:$4 sm:$0xff]   ;;  %v1856_v34 = vld [vmem:[%s2331_s0 + $0x80] ss:$28 sps:$4 sm:$0xff]  }
  0x22   :  { %855 = vmatmul.mubr.bf16.vlgmr.msra.gmra.mrb[0].mxu0 %v1773_v31  ;;  %1710 = vmatprep.subr.bf16.mxu1 %v1814_v58  ;;  %v1854_v31 = vld [vmem:[%s2331_s0 + $0x84] ss:$28 sps:$4 sm:$0xff]   ;;  %v1866_v36 = vld [vmem:[%s2331_s0 + $0x130] ss:$28 sps:$4 sm:$0xff]  }
  0x23   :  { %1631 = vmatpush3.bf16.msra.mxu0 %v1781_v37  ;;  %862 = vmatprep.mubr.bf16.mxu0 %v1782_v38  ;;  %v1873_v37 = vld [vmem:[%s2331_s0 + $0x168] ss:$28 sps:$4 sm:$0xff]   ;;  %v1861_v38 = vld [vmem:[%s2331_s0 + $0xb8] ss:$28 sps:$4 sm:$0xff]  }
  0x24   :  { %952 = vmatmul.mubr.bf16.vlgmr.msra.gmra.mrb[0].mxu1 %v1778_v35  ;;  %1632 = vmatprep.subr.bf16.mxu0 %v1785_v40  ;;  %v1859_v35 = vld [vmem:[%s2331_s0 + $0xbc] ss:$28 sps:$4 sm:$0xff]  }
  0x25   :  { %959 = vmatprep.mubr.bf16.mxu1 %v1786_v41  ;;  %1711 = vmatpush3.bf16.msra.mxu1 %v1814_v58  ;;  %v1874_v40 = vld [vmem:[%s2331_s0 + $0x1a0] ss:$28 sps:$4 sm:$0xff]   ;;  %v1864_v41 = vld [vmem:[%s2331_s0 + $0xf0] ss:$28 sps:$4 sm:$0xff]  }
  0x26   :  { %1712 = vmatprep.subr.bf16.mxu1 %v1819_v62 }
  0x27   :  { %1633 = vmatpush3.bf16.msra.mxu0 %v1788_v42  ;;  %v1867_v42 = vld [vmem:[%s2331_s0 + $0x12c] ss:$28 sps:$4 sm:$0xff]  }
  0x28   :  { %1634 = vmatprep.subr.bf16.mxu0 %v1793_v45  ;;  %v1872_v45 = vld [vmem:[%s2331_s0 + $0x160] ss:$28 sps:$4 sm:$0xff]  }
  0x29   :  { %1713 = vmatpush3.bf16.msra.mxu1 %v1819_v62 }
  0x2a   :  { %863 = vmatmul.mubr.bf16.gmra.mrb[4].mxu0 %v1784_v39  ;;  %1714 = vmatprep.subr.bf16.mxu1 %v1824_v0  ;;  %v1862_v39 = vld [vmem:[%s2331_s0 + $0xf4] ss:$28 sps:$4 sm:$0xff]  }
  0x2b   :  { %870 = vmatprep.mubr.bf16.mxu0 %v1790_v44  ;;  %1635 = vmatpush3.bf16.msra.mxu0 %v1796_v47  ;;  %v1870_v44 = vld [vmem:[%s2331_s0 + $0x164] ss:$28 sps:$4 sm:$0xff]   ;;  %v1877_v47 = vld [vmem:[%s2331_s0 + $0x198] ss:$28 sps:$4 sm:$0xff]  }
  0x2c   :  { %960 = vmatmul.mubr.bf16.gmra.mrb[4].mxu1 %v1789_v43  ;;  %1636 = vmatprep.subr.bf16.mxu0 %v1801_v50  ;;  %v1869_v43 = vld [vmem:[%s2331_s0 + $0x128] ss:$28 sps:$4 sm:$0xff]  }
  0x2d   :  { %967 = vmatprep.mubr.bf16.mxu1 %v1794_v46  ;;  %1715 = vmatpush3.bf16.msra.mxu1 %v1824_v0  ;;  %v1875_v46 = vld [vmem:[%s2331_s0 + $0x19c] ss:$28 sps:$4 sm:$0xff]  }
  0x2e   :  { %1716 = vmatprep.subr.bf16.mxu1 %v1829_v5 }
  0x2f   :  { %1637 = vmatpush3.bf16.msra.mxu0 %v1804_v52 }
  0x30   :  { %1638 = vmatprep.subr.bf16.mxu0 %v1809_v54 }
  0x31   :  { %1717 = vmatpush3.bf16.msra.mxu1 %v1829_v5 }
  0x32   :  { %871 = vmatmul.mubr.bf16.gmra.mrb[8].mxu0 %v1792_v48  ;;  %1718 = vmatprep.subr.bf16.mxu1 %v1834_v8 }
  0x33   :  { %878 = vmatprep.mubr.bf16.mxu0 %v1798_v49  ;;  %1639 = vmatpush3.bf16.msra.mxu0 %v1812_v56  ;;  %v2237_v49 = vld [vmem:[%s2332_s2] ss:$0 sm:$0xff] }
  0x34   :  { %968 = vmatmul.mubr.bf16.gmra.mrb[8].mxu1 %v1797_v51  ;;  %1640 = vmatprep.subr.bf16.mxu0 %v1818_v61 }
  0x35   :  { %975 = vmatprep.mubr.bf16.mxu1 %v1802_v53  ;;  %1719 = vmatpush3.bf16.msra.mxu1 %v1834_v8 }
  0x36   :  { %1720 = vmatprep.subr.bf16.mxu1 %v1839_v13 }
  0x37   :  { %1641 = vmatpush3.bf16.msra.mxu0 %v1822_v63 }
  0x38   :  { %1642 = vmatprep.subr.bf16.mxu0 %v1828_v4 }
  0x39   :  { %1721 = vmatpush3.bf16.msra.mxu1 %v1839_v13 }
  0x3a   :  { %879 = vmatmul.mubr.bf16.gmra.mrb[12].mxu0 %v1800_v55  ;;  %1722 = vmatprep.subr.bf16.mxu1 %v1844_v16 }
  0x3b   :  { %886 = vmatprep.mubr.bf16.mxu0 %v1806_v57  ;;  %1643 = vmatpush3.bf16.msra.mxu0 %v1832_v7 }
  0x3c   :  { %976 = vmatmul.mubr.bf16.gmra.mrb[12].mxu1 %v1805_v59  ;;  %1644 = vmatprep.subr.bf16.mxu0 %v1838_v10 }
  0x3d   :  { %983 = vmatprep.mubr.bf16.mxu1 %v1810_v60  ;;  %1723 = vmatpush3.bf16.msra.mxu1 %v1844_v16 }
  0x3e   :  { %1724 = vmatprep.subr.bf16.mxu1 %v1848_v19 }
  0x3f   :  { %1645 = vmatpush3.bf16.msra.mxu0 %v1842_v14 }
  0x41   :  { %1725 = vmatpush3.bf16.msra.mxu1 %v1848_v19 }
  0x42   :  { %887 = vmatmul.mubr.bf16.gmra.mrb[16].mxu0 %v1808_v1 }
  0x43   :  { %894 = vmatprep.mubr.bf16.mxu0 %v1815_v3 }
  0x44   :  { %984 = vmatmul.mubr.bf16.gmra.mrb[16].mxu1 %v1813_v2 }
  0x45   :  { %991 = vmatprep.mubr.bf16.mxu1 %v1820_v6 }
  0x4a   :  { %895 = vmatmul.mubr.bf16.gmra.mrb[20].mxu0 %v1817_v9 }
  0x4b   :  { %902 = vmatprep.mubr.bf16.mxu0 %v1825_v12 }
  0x4c   :  { %992 = vmatmul.mubr.bf16.gmra.mrb[20].mxu1 %v1823_v11 }
  0x4d   :  { %999 = vmatprep.mubr.bf16.mxu1 %v1830_v15 }
  0x52   :  { %903 = vmatmul.mubr.bf16.gmra.mrb[24].mxu0 %v1827_v17 }
  0x53   :  { %910 = vmatprep.mubr.bf16.mxu0 %v1835_v18 }
  0x54   :  { %1000 = vmatmul.mubr.bf16.gmra.mrb[24].mxu1 %v1833_v20 }
  0x55   :  { %1007 = vmatprep.mubr.bf16.mxu1 %v1840_v21 }
  0x5a   :  { %911 = vmatmul.mubr.bf16.gmra.mrb[28].mxu0 %v1837_v22 }
  0x5b   :  { %1048 = vmatprep.mubr.bf16.mxu0 %v1847_v23 }
  0x5c   :  { %1008 = vmatmul.mubr.bf16.gmra.mrb[28].mxu1 %v1843_v24 }
  0x5d   :  { %1726 = vmatprep.mubr.bf16.mxu1 %v1849_v25 }
  0x62   :  { %1049 = vmatmul.mubr.bf16.vlgmr.msra.gmra.mrb[32].mxu0 %v1845_v26 }
  0x63   :  { %1056 = vmatprep.mubr.bf16.mxu0 %v1851_v27 }
  0x64   :  { %1727 = vmatmul.mubr.bf16.vlgmr.msra.gmra.mrb[32].mxu1 %v1850_v28 }
  0x65   :  { %1730 = vmatprep.mubr.bf16.mxu1 %v1857_v29 }
  0x6a   :  { %1057 = vmatmul.mubr.bf16.gmra.mrb[36].mxu0 %v1853_v30 }
  0x6b   :  { %1064 = vmatprep.mubr.bf16.mxu0 %v1854_v31 }
  0x6c   :  { %1731 = vmatmul.mubr.bf16.gmra.mrb[36].mxu1 %v1858_v32 }
  0x6d   :  { %1734 = vmatprep.mubr.bf16.mxu1 %v1865_v33 }
  0x72   :  { %1065 = vmatmul.mubr.bf16.gmra.mrb[40].mxu0 %v1856_v34 }
  0x73   :  { %1072 = vmatprep.mubr.bf16.mxu0 %v1859_v35 }
  0x74   :  { %1735 = vmatmul.mubr.bf16.gmra.mrb[40].mxu1 %v1866_v36 }
  0x75   :  { %1738 = vmatprep.mubr.bf16.mxu1 %v1873_v37 }
  0x7a   :  { %1073 = vmatmul.mubr.bf16.gmra.mrb[44].mxu0 %v1861_v38 }
  0x7b   :  { %1080 = vmatprep.mubr.bf16.mxu0 %v1862_v39 }
  0x7c   :  { %1739 = vmatmul.mubr.bf16.gmra.mrb[44].mxu1 %v1874_v40 }
  0x82   :  { %1081 = vmatmul.mubr.bf16.gmra.mrb[48].mxu0 %v1864_v41 }
  0x83   :  { %1088 = vmatprep.mubr.bf16.mxu0 %v1867_v42 }
  0x8a   :  { %1089 = vmatmul.mubr.bf16.gmra.mrb[52].mxu0 %v1869_v43 }
  0x8b   :  { %1096 = vmatprep.mubr.bf16.mxu0 %v1870_v44 }
  0x92   :  { %1097 = vmatmul.mubr.bf16.gmra.mrb[56].mxu0 %v1872_v45 }
  0x93   :  { %1104 = vmatprep.mubr.bf16.mxu0 %v1875_v46 }
  0x9a   :  { %1105 = vmatmul.mubr.bf16.gmra.mrb[60].mxu0 %v1877_v47 }
  0xf5   :  { %v1518_v48 = vpop.f32.mrb[0].mxu0 }
  0xf6   :  { %v1519_v50 = vpop.f32.mrb[1].mxu0 }
  0xf7   :  { %v1520_v51 = vadd.f32 %v1519_v50, %v1518_v48  ;;  %v1521_v52 = vpop.f32.mrb[2].mxu0  ;;  %v1582_v53 = vpop.f32.mrb[0].mxu1 }
  0xf8   :  { %v1522_v54 = vpop.f32.mrb[3].mxu0  ;;  %v1583_v57 = vpop.f32.mrb[1].mxu1 }
  0xf9   :  { %v857_v55 = vadd.f32 %v1520_v51, %v2237_v49  ;;  %v1523_v56 = vadd.f32 %v1522_v54, %v1521_v52  ;;  %v1584_v58 = vadd.f32 %v1583_v57, %v1582_v53  ;;  %v1585_v59 = vpop.f32.mrb[2].mxu1 }
  0xfa   :  { %v1586_v61 = vpop.f32.mrb[3].mxu1 }
  0xfb   :  { %v860_v60 = vadd.f32 %v1523_v56, %v2237_v49  ;;  %v2241_v62 = vadd.f32 %v1584_v58, %v857_v55  ;;  %v1587_v63 = vadd.f32 %v1586_v61, %v1585_v59 }
  0xfd   :  { %v1524_v0 = vpop.f32.mrb[4].mxu0  ;;  %v2243_v1 = vadd.f32 %v1587_v63, %v860_v60 }
  0xfe   :  { %v1525_v2 = vpop.f32.mrb[5].mxu0 }
  0xff   :  { %v1526_v3 = vadd.f32 %v1525_v2, %v1524_v0  ;;  %v1527_v4 = vpop.f32.mrb[6].mxu0  ;;  %v1588_v5 = vpop.f32.mrb[4].mxu1 }
 0x100   :  { %v1528_v6 = vpop.f32.mrb[7].mxu0  ;;  %v1589_v9 = vpop.f32.mrb[5].mxu1 }
 0x101   :  { %v865_v7 = vadd.f32 %v1526_v3, %v2237_v49  ;;  %v1529_v8 = vadd.f32 %v1528_v6, %v1527_v4  ;;  %v1590_v10 = vadd.f32 %v1589_v9, %v1588_v5  ;;  %v1591_v11 = vpop.f32.mrb[6].mxu1 }
 0x102   :  { %v1592_v13 = vpop.f32.mrb[7].mxu1 }
 0x103   :  { %v868_v12 = vadd.f32 %v1529_v8, %v2237_v49  ;;  %v2247_v14 = vadd.f32 %v1590_v10, %v865_v7  ;;  %v1593_v15 = vadd.f32 %v1592_v13, %v1591_v11 }
 0x105   :  { %v1530_v16 = vpop.f32.mrb[8].mxu0  ;;  %v2249_v17 = vadd.f32 %v1593_v15, %v868_v12 }
 0x106   :  { %v1531_v18 = vpop.f32.mrb[9].mxu0 }
 0x107   :  { %v1532_v19 = vadd.f32 %v1531_v18, %v1530_v16  ;;  %v1533_v20 = vpop.f32.mrb[10].mxu0  ;;  %v1594_v21 = vpop.f32.mrb[8].mxu1 }
 0x108   :  { %v1534_v22 = vpop.f32.mrb[11].mxu0  ;;  %v1595_v25 = vpop.f32.mrb[9].mxu1 }
 0x109   :  { %v873_v23 = vadd.f32 %v1532_v19, %v2237_v49  ;;  %v1535_v24 = vadd.f32 %v1534_v22, %v1533_v20  ;;  %v1596_v26 = vadd.f32 %v1595_v25, %v1594_v21  ;;  %v1597_v27 = vpop.f32.mrb[10].mxu1 }
 0x10a   :  { %v1598_v29 = vpop.f32.mrb[11].mxu1 }
 0x10b   :  { %v876_v28 = vadd.f32 %v1535_v24, %v2237_v49  ;;  %v2253_v30 = vadd.f32 %v1596_v26, %v873_v23  ;;  %v1599_v31 = vadd.f32 %v1598_v29, %v1597_v27 }
 0x10d   :  { %v1536_v32 = vpop.f32.mrb[12].mxu0  ;;  %v2255_v33 = vadd.f32 %v1599_v31, %v876_v28 }
 0x10e   :  { %v1537_v34 = vpop.f32.mrb[13].mxu0 }
 0x10f   :  { %v1538_v35 = vadd.f32 %v1537_v34, %v1536_v32  ;;  %v1539_v36 = vpop.f32.mrb[14].mxu0  ;;  %v1600_v37 = vpop.f32.mrb[12].mxu1 }
 0x110   :  { %v1540_v38 = vpop.f32.mrb[15].mxu0  ;;  %v1601_v41 = vpop.f32.mrb[13].mxu1 }
 0x111   :  { %v881_v39 = vadd.f32 %v1538_v35, %v2237_v49  ;;  %v1541_v40 = vadd.f32 %v1540_v38, %v1539_v36  ;;  %v1602_v42 = vadd.f32 %v1601_v41, %v1600_v37  ;;  %v1603_v43 = vpop.f32.mrb[14].mxu1 }
 0x112   :  { %v1604_v45 = vpop.f32.mrb[15].mxu1 }
 0x113   :  { %v884_v44 = vadd.f32 %v1541_v40, %v2237_v49  ;;  %v2259_v46 = vadd.f32 %v1602_v42, %v881_v39  ;;  %v1605_v47 = vadd.f32 %v1604_v45, %v1603_v43 }
 0x115   :  { %v1542_v48 = vpop.f32.mrb[16].mxu0  ;;  %v2261_v50 = vadd.f32 %v1605_v47, %v884_v44 }
 0x116   :  { %v1543_v51 = vpop.f32.mrb[17].mxu0 }
 0x117   :  { %v1544_v52 = vadd.f32 %v1543_v51, %v1542_v48  ;;  %v1545_v53 = vpop.f32.mrb[18].mxu0  ;;  %v1606_v54 = vpop.f32.mrb[16].mxu1 }
 0x118   :  { %v1546_v55 = vpop.f32.mrb[19].mxu0  ;;  %v1607_v58 = vpop.f32.mrb[17].mxu1 }
 0x119   :  { %v889_v56 = vadd.f32 %v1544_v52, %v2237_v49  ;;  %v1547_v57 = vadd.f32 %v1546_v55, %v1545_v53  ;;  %v1608_v59 = vadd.f32 %v1607_v58, %v1606_v54  ;;  %v1609_v60 = vpop.f32.mrb[18].mxu1 }
 0x11a   :  { %v1610_v63 = vpop.f32.mrb[19].mxu1 }
 0x11b   :  { %v892_v61 = vadd.f32 %v1547_v57, %v2237_v49  ;;  %v2265_v0 = vadd.f32 %v1608_v59, %v889_v56  ;;  %v1611_v2 = vadd.f32 %v1610_v63, %v1609_v60 }
 0x11d   :  { %v1548_v3 = vpop.f32.mrb[20].mxu0  ;;  %v2267_v4 = vadd.f32 %v1611_v2, %v892_v61 }
 0x11e   :  { %v1549_v5 = vpop.f32.mrb[21].mxu0 }
 0x11f   :  { %v1550_v6 = vadd.f32 %v1549_v5, %v1548_v3  ;;  %v1551_v7 = vpop.f32.mrb[22].mxu0  ;;  %v1612_v8 = vpop.f32.mrb[20].mxu1 }
 0x120   :  { %v1552_v9 = vpop.f32.mrb[23].mxu0  ;;  %v1613_v12 = vpop.f32.mrb[21].mxu1 }
 0x121   :  { %v897_v10 = vadd.f32 %v1550_v6, %v2237_v49  ;;  %v1553_v11 = vadd.f32 %v1552_v9, %v1551_v7  ;;  %v1614_v13 = vadd.f32 %v1613_v12, %v1612_v8  ;;  %v1615_v15 = vpop.f32.mrb[22].mxu1 }
 0x122   :  { %v1616_v18 = vpop.f32.mrb[23].mxu1 }
 0x123   :  { %v900_v16 = vadd.f32 %v1553_v11, %v2237_v49  ;;  %v2271_v19 = vadd.f32 %v1614_v13, %v897_v10  ;;  %v1617_v20 = vadd.f32 %v1616_v18, %v1615_v15 }
 0x125   :  { %v1554_v21 = vpop.f32.mrb[24].mxu0  ;;  %v2273_v22 = vadd.f32 %v1617_v20, %v900_v16 }
 0x126   :  { %v1555_v23 = vpop.f32.mrb[25].mxu0 }
 0x127   :  { %v1556_v24 = vadd.f32 %v1555_v23, %v1554_v21  ;;  %v1557_v25 = vpop.f32.mrb[26].mxu0  ;;  %v1618_v26 = vpop.f32.mrb[24].mxu1 }
 0x128   :  { %v1558_v27 = vpop.f32.mrb[27].mxu0  ;;  %v1619_v31 = vpop.f32.mrb[25].mxu1 }
 0x129   :  { %v905_v28 = vadd.f32 %v1556_v24, %v2237_v49  ;;  %v1559_v29 = vadd.f32 %v1558_v27, %v1557_v25  ;;  %v1620_v32 = vadd.f32 %v1619_v31, %v1618_v26  ;;  %v1621_v34 = vpop.f32.mrb[26].mxu1 }
 0x12a   :  { %v1622_v36 = vpop.f32.mrb[27].mxu1 }
 0x12b   :  { %v908_v35 = vadd.f32 %v1559_v29, %v2237_v49  ;;  %v2277_v37 = vadd.f32 %v1620_v32, %v905_v28  ;;  %v1623_v38 = vadd.f32 %v1622_v36, %v1621_v34 }
 0x12d   :  { %v1560_v39 = vpop.f32.mrb[28].mxu0  ;;  %v2279_v40 = vadd.f32 %v1623_v38, %v908_v35 }
 0x12e   :  { %v1561_v41 = vpop.f32.mrb[29].mxu0 }
 0x12f   :  { %v1562_v42 = vadd.f32 %v1561_v41, %v1560_v39  ;;  %v1563_v43 = vpop.f32.mrb[30].mxu0  ;;  %v1624_v44 = vpop.f32.mrb[28].mxu1 }
 0x130   :  { %v1564_v45 = vpop.f32.mrb[31].mxu0  ;;  %v1625_v51 = vpop.f32.mrb[29].mxu1 }
 0x131   :  { %v913_v47 = vadd.f32 %v1562_v42, %v2237_v49  ;;  %v1565_v48 = vadd.f32 %v1564_v45, %v1563_v43  ;;  %v1626_v52 = vadd.f32 %v1625_v51, %v1624_v44  ;;  %v1627_v53 = vpop.f32.mrb[30].mxu1 }
 0x132   :  { %v1628_v55 = vpop.f32.mrb[31].mxu1 }
 0x133   :  { %v916_v54 = vadd.f32 %v1565_v48, %v2237_v49  ;;  %v2283_v56 = vadd.f32 %v1626_v52, %v913_v47  ;;  %v1629_v57 = vadd.f32 %v1628_v55, %v1627_v53 }
 0x135   :  { %v1646_v58 = vpop.f32.mrb[32].mxu0  ;;  %v2285_v59 = vadd.f32 %v1629_v57, %v916_v54 }
 0x136   :  { %v1647_v60 = vpop.f32.mrb[33].mxu0 }
 0x137   :  { %v1648_v61 = vadd.f32 %v1647_v60, %v1646_v58  ;;  %v1649_v63 = vpop.f32.mrb[34].mxu0  ;;  %v1728_v3 = vpop.f32.mrb[32].mxu1 }
 0x138   :  { %v1650_v2 = vpop.f32.mrb[35].mxu0  ;;  %v1147_v7 = vpop.f32.mrb[33].mxu1 }
 0x139   :  { %v1651_v5 = vadd.f32 %v1650_v2, %v1649_v63  ;;  %v1051_v6 = vadd.f32 %v1648_v61, %v2241_v62  ;;  %v1729_v8 = vpop.f32.mrb[34].mxu1 }
 0x13a   :  { %v1150_v10 = vpop.f32.mrb[35].mxu1 }
 0x13b   :  { %v1148_v9 = vadd.f32 %v1147_v7, %v1051_v6  ;;  %v1054_v49 = vadd.f32 %v1651_v5, %v2243_v1 }
 0x13d   :  { %v1151_v11 = vadd.f32 %v1150_v10, %v1054_v49  ;;  %v1652_v12 = vpop.f32.mrb[36].mxu0  ;;  %v1210_v15 = vmax.f32 %v1148_v9, 0.0 }
 0x13e   :  { %v1653_v13 = vpop.f32.mrb[37].mxu0 }
 0x13f   :  { %v1211_v16 = vmax.f32 %v1151_v11, 0.0  ;;  %v1654_v18 = vadd.f32 %v1653_v13, %v1652_v12  ;;  %v1655_v20 = vpop.f32.mrb[38].mxu0  ;;  %v1732_v23 = vpop.f32.mrb[36].mxu1 }
 0x140   :  { %v1656_v21 = vpop.f32.mrb[39].mxu0  ;;  %v1163_v62 = vpop.f32.mrb[37].mxu1 }
 0x141   :  { %v1458_v24 = vpack.c.bf16 %v1211_v16, %v1210_v15  ;;  %v1059_v25 = vadd.f32 %v1654_v18, %v2247_v14  ;;  %v1657_v26 = vadd.f32 %v1656_v21, %v1655_v20  ;;  %v1733_v27 = vpop.f32.mrb[38].mxu1 }
 0x142   :  { %v1166_v29 = vpop.f32.mrb[39].mxu1 }
 0x143   :  { %1459 = vst [vmem:[%s2333_s3] sm:$0xff] %v1458_v24   ;;  %v1156_v1 = vadd.f32 %v1728_v3, %v1059_v25  ;;  %v1062_v28 = vadd.f32 %v1657_v26, %v2249_v17 }
 0x145   :  { %v1159_v31 = vadd.f32 %v1729_v8, %v1062_v28  ;;  %v1658_v32 = vpop.f32.mrb[40].mxu0  ;;  %v1212_v35 = vmax.f32 %v1156_v1, 0.0 }
 0x146   :  { %v1659_v34 = vpop.f32.mrb[41].mxu0 }
 0x147   :  { %v1213_v36 = vmax.f32 %v1159_v31, 0.0  ;;  %v1660_v38 = vadd.f32 %v1659_v34, %v1658_v32  ;;  %v1661_v39 = vpop.f32.mrb[42].mxu0  ;;  %v1736_v14 = vpop.f32.mrb[40].mxu1 }
 0x148   :  { %v1662_v41 = vpop.f32.mrb[43].mxu0  ;;  %v1179_v45 = vpop.f32.mrb[41].mxu1 }
 0x149   :  { %v1463_v42 = vpack.c.bf16 %v1213_v36, %v1212_v35  ;;  %v1663_v43 = vadd.f32 %v1662_v41, %v1661_v39  ;;  %v1067_v44 = vadd.f32 %v1660_v38, %v2253_v30  ;;  %v1737_v47 = vpop.f32.mrb[42].mxu1 }
 0x14a   :  { %v1182_v51 = vpop.f32.mrb[43].mxu1 }
 0x14b   :  { %1495 = vst [vmem:[%s2333_s3 + $0x8] sm:$0xff] %v1463_v42   ;;  %v1164_v17 = vadd.f32 %v1163_v62, %v1067_v44  ;;  %v1070_v48 = vadd.f32 %v1663_v43, %v2255_v33 }
 0x14d   :  { %v1167_v52 = vadd.f32 %v1166_v29, %v1070_v48  ;;  %v1664_v53 = vpop.f32.mrb[44].mxu0  ;;  %v1214_v55 = vmax.f32 %v1164_v17, 0.0 }
 0x14e   :  { %v1665_v54 = vpop.f32.mrb[45].mxu0 }
 0x14f   :  { %v1215_v57 = vmax.f32 %v1167_v52, 0.0  ;;  %v1666_v58 = vadd.f32 %v1665_v54, %v1664_v53  ;;  %v1667_v60 = vpop.f32.mrb[46].mxu0  ;;  %v2299_v63 = vpop.f32.mrb[44].mxu1 }
 0x150   :  { %v1668_v61 = vpop.f32.mrb[47].mxu0  ;;  %v1195_v5 = vpop.f32.mrb[45].mxu1 }
 0x151   :  { %v1468_v30 = vpack.c.bf16 %v1215_v57, %v1214_v55  ;;  %v1075_v2 = vadd.f32 %v1666_v58, %v2259_v46  ;;  %v1669_v3 = vadd.f32 %v1668_v61, %v1667_v60  ;;  %v1741_v6 = vpop.f32.mrb[46].mxu1 }
 0x152   :  { %v1198_v8 = vpop.f32.mrb[47].mxu1 }
 0x153   :  { %1496 = vst [vmem:[%s2333_s3 + $0x10] sm:$0xff] %v1468_v30   ;;  %v1172_v33 = vadd.f32 %v1732_v23, %v1075_v2  ;;  %v1078_v7 = vadd.f32 %v1669_v3, %v2261_v50 }
 0x155   :  { %v1175_v9 = vadd.f32 %v1733_v27, %v1078_v7  ;;  %v1670_v49 = vpop.f32.mrb[48].mxu0  ;;  %v1216_v11 = vmax.f32 %v1172_v33, 0.0 }
 0x156   :  { %v1671_v10 = vpop.f32.mrb[49].mxu0 }
 0x157   :  { %v1217_v12 = vmax.f32 %v1175_v9, 0.0  ;;  %v1672_v13 = vadd.f32 %v1671_v10, %v1670_v49  ;;  %v1673_v15 = vpop.f32.mrb[50].mxu0 }
 0x158   :  { %v1674_v16 = vpop.f32.mrb[51].mxu0 }
 0x159   :  { %v1473_v46 = vpack.c.bf16 %v1217_v12, %v1216_v11  ;;  %v1675_v18 = vadd.f32 %v1674_v16, %v1673_v15  ;;  %v1083_v20 = vadd.f32 %v1672_v13, %v2265_v0 }
 0x15b   :  { %1497 = vst [vmem:[%s2333_s3 + $0x18] sm:$0xff] %v1473_v46   ;;  %v1180_v21 = vadd.f32 %v1179_v45, %v1083_v20  ;;  %v1086_v50 = vadd.f32 %v1675_v18, %v2267_v4 }
 0x15d   :  { %v1183_v23 = vadd.f32 %v1182_v51, %v1086_v50  ;;  %v1676_v24 = vpop.f32.mrb[52].mxu0  ;;  %v1218_v26 = vmax.f32 %v1180_v21, 0.0 }
 0x15e   :  { %v1677_v25 = vpop.f32.mrb[53].mxu0 }
 0x15f   :  { %v1219_v62 = vmax.f32 %v1183_v23, 0.0  ;;  %v1678_v27 = vadd.f32 %v1677_v25, %v1676_v24  ;;  %v1679_v1 = vpop.f32.mrb[54].mxu0 }
 0x160   :  { %v1680_v28 = vpop.f32.mrb[55].mxu0 }
 0x161   :  { %v1478_v29 = vpack.c.bf16 %v1219_v62, %v1218_v26  ;;  %v1091_v31 = vadd.f32 %v1678_v27, %v2271_v19  ;;  %v1681_v32 = vadd.f32 %v1680_v28, %v1679_v1 }
 0x163   :  { %1498 = vst [vmem:[%s2333_s3 + $0x20] sm:$0xff] %v1478_v29   ;;  %v1188_v0 = vadd.f32 %v1736_v14, %v1091_v31  ;;  %v1094_v34 = vadd.f32 %v1681_v32, %v2273_v22 }
 0x165   :  { %v1191_v4 = vadd.f32 %v1737_v47, %v1094_v34  ;;  %v1682_v35 = vpop.f32.mrb[56].mxu0  ;;  %v1220_v38 = vmax.f32 %v1188_v0, 0.0 }
 0x166   :  { %v1683_v36 = vpop.f32.mrb[57].mxu0 }
 0x167   :  { %v1221_v39 = vmax.f32 %v1191_v4, 0.0  ;;  %v1684_v41 = vadd.f32 %v1683_v36, %v1682_v35  ;;  %v1685_v42 = vpop.f32.mrb[58].mxu0 }
 0x168   :  { %v1686_v43 = vpop.f32.mrb[59].mxu0 }
 0x169   :  { %v1483_v44 = vpack.c.bf16 %v1221_v39, %v1220_v38  ;;  %v1687_v45 = vadd.f32 %v1686_v43, %v1685_v42  ;;  %v1099_v19 = vadd.f32 %v1684_v41, %v2277_v37 }
 0x16b   :  { %1499 = vst [vmem:[%s2333_s3 + $0x28] sm:$0xff] %v1483_v44   ;;  %v1196_v17 = vadd.f32 %v1195_v5, %v1099_v19  ;;  %v1102_v14 = vadd.f32 %v1687_v45, %v2279_v40 }
 0x16d   :  { %v1199_v22 = vadd.f32 %v1198_v8, %v1102_v14  ;;  %v1688_v47 = vpop.f32.mrb[60].mxu0  ;;  %v1222_v51 = vmax.f32 %v1196_v17, 0.0 }
 0x16e   :  { %v1689_v48 = vpop.f32.mrb[61].mxu0 }
 0x16f   :  { %v1223_v52 = vmax.f32 %v1199_v22, 0.0  ;;  %v1690_v53 = vadd.f32 %v1689_v48, %v1688_v47  ;;  %v1691_v54 = vpop.f32.mrb[62].mxu0 }
 0x170   :  { %v1692_v55 = vpop.f32.mrb[63].mxu0 }
 0x171   :  { %v1488_v57 = vpack.c.bf16 %v1223_v52, %v1222_v51  ;;  %v1107_v58 = vadd.f32 %v1690_v53, %v2283_v56  ;;  %v1693_v60 = vadd.f32 %v1692_v55, %v1691_v54 }
 0x173   :  { %1500 = vst [vmem:[%s2333_s3 + $0x30] sm:$0xff] %v1488_v57   ;;  %v1204_v37 = vadd.f32 %v2299_v63, %v1107_v58  ;;  %v1110_v40 = vadd.f32 %v1693_v60, %v2285_v59 }
 0x175   :  { %v1207_v61 = vadd.f32 %v1741_v6, %v1110_v40  ;;  %v1224_v30 = vmax.f32 %v1204_v37, 0.0 }
 0x177   :  { %v1225_v2 = vmax.f32 %v1207_v61, 0.0 }
 0x179   :  { %v1493_v3 = vpack.c.bf16 %v1225_v2, %v1224_v30 }
 0x17b   :  { %1501 = vst [vmem:[%s2333_s3 + $0x38] sm:$0xff] %v1493_v3  }

// kernel: bottleneck_forward.7
= control target key start
LH: loop header
LB: loop body
LE: loop exit
PB: predicated region body
PF: predicated region fallthrough
CT: control target
= control target key end

     0   :  { %s411_s1 = inlined_call_operand.vmem [shape: bf16[128,128], index: 1, kind: input, shape index: {}]   ;;  %s412_s0 = inlined_call_operand.vmem [shape: bf16[64,128], index: 0, kind: input, shape index: {}]   ;;  %s413_s2 = inlined_call_operand.vmem [shape: f32[1,128], index: 2, kind: input, shape index: {}]   ;;  %s414_s3 = inlined_call_operand.vmem [shape: f32[64,128], index: 3, kind: input, shape index: {}]   ;;  %s415_s4 = inlined_call_operand.vmem [shape: f32[64,128], index: 4, kind: output, shape index: {}]  }
   0x1   :  { %v287_v0 = vld [vmem:[%s411_s1] sm:$0xff]   ;;  %v288_v1 = vld [vmem:[%s411_s1 + $0x8] sm:$0xff]   ;;  %v289_v2 = vld [vmem:[%s411_s1 + $0x10] sm:$0xff]  }
   0x2   :  { %247 = vmatprep.subr.bf16.mxu0 %v287_v0  ;;  %271 = vmatprep.subr.bf16.mxu1 %v287_v0  ;;  %v290_v3 = vld [vmem:[%s411_s1 + $0x18] sm:$0xff]   ;;  %v295_v4 = vld [vmem:[%s412_s0] sm:$0xff]   ;;  %v296_v5 = vld [vmem:[%s412_s0 + $0x10] sm:$0xff]  }
   0x3   :  { %248 = vmatpush3.bf16.msra.mxu0 %v287_v0  ;;  %279 = vmatpush3.bf16.msra.mxu1 %v287_v0  ;;  %v291_v6 = vld [vmem:[%s411_s1 + $0x20] sm:$0xff]   ;;  %v292_v7 = vld [vmem:[%s411_s1 + $0x28] sm:$0xff]   ;;  %v293_v8 = vld [vmem:[%s411_s1 + $0x30] sm:$0xff]  }
   0x4   :  { %249 = vmatprep.subr.bf16.mxu0 %v288_v1  ;;  %272 = vmatprep.subr.bf16.mxu1 %v288_v1  ;;  %v294_v9 = vld [vmem:[%s411_s1 + $0x38] sm:$0xff]   ;;  %v297_v10 = vld [vmem:[%s412_s0 + $0x8] sm:$0xff]   ;;  %v222_v12 = vld [vmem:[%s413_s2] ss:$0 sm:$0xff] }
   0x5   :  { %263 = vmatprep.mubr.bf16.mxu0 %v295_v4  ;;  %267 = vmatprep.mubr.bf16.mxu1 %v296_v5  ;;  %v298_v11 = vld [vmem:[%s412_s0 + $0x18] sm:$0xff]   ;;  %v188_v14 = vld [vmem:[%s414_s3 + $0x10] sm:$0xff]  ;;  %v186_v20 = vld [vmem:[%s414_s3] sm:$0xff] }
   0x6   :  { %v192_v16 = vld [vmem:[%s414_s3 + $0x30] sm:$0xff]  ;;  %v190_v22 = vld [vmem:[%s414_s3 + $0x20] sm:$0xff]  ;;  %v189_v26 = vld [vmem:[%s414_s3 + $0x18] sm:$0xff] }
   0x7   :  { %250 = vmatpush3.bf16.msra.mxu0 %v288_v1  ;;  %280 = vmatpush3.bf16.msra.mxu1 %v288_v1  ;;  %v193_v28 = vld [vmem:[%s414_s3 + $0x38] sm:$0xff]  ;;  %v187_v34 = vld [vmem:[%s414_s3 + $0x8] sm:$0xff] }
   0x8   :  { %251 = vmatprep.subr.bf16.mxu0 %v289_v2  ;;  %273 = vmatprep.subr.bf16.mxu1 %v289_v2  ;;  %v191_v36 = vld [vmem:[%s414_s3 + $0x28] sm:$0xff] }
   0xb   :  { %252 = vmatpush3.bf16.msra.mxu0 %v289_v2  ;;  %281 = vmatpush3.bf16.msra.mxu1 %v289_v2 }
   0xc   :  { %253 = vmatprep.subr.bf16.mxu0 %v290_v3  ;;  %274 = vmatprep.subr.bf16.mxu1 %v290_v3 }
   0xf   :  { %254 = vmatpush3.bf16.msra.mxu0 %v290_v3  ;;  %282 = vmatpush3.bf16.msra.mxu1 %v290_v3 }
  0x10   :  { %255 = vmatprep.subr.bf16.mxu0 %v291_v6  ;;  %275 = vmatprep.subr.bf16.mxu1 %v291_v6 }
  0x13   :  { %256 = vmatpush3.bf16.msra.mxu0 %v291_v6  ;;  %283 = vmatpush3.bf16.msra.mxu1 %v291_v6 }
  0x14   :  { %257 = vmatprep.subr.bf16.mxu0 %v292_v7  ;;  %276 = vmatprep.subr.bf16.mxu1 %v292_v7 }
  0x17   :  { %258 = vmatpush3.bf16.msra.mxu0 %v292_v7  ;;  %284 = vmatpush3.bf16.msra.mxu1 %v292_v7 }
  0x18   :  { %259 = vmatprep.subr.bf16.mxu0 %v293_v8  ;;  %277 = vmatprep.subr.bf16.mxu1 %v293_v8 }
  0x1b   :  { %260 = vmatpush3.bf16.msra.mxu0 %v293_v8  ;;  %285 = vmatpush3.bf16.msra.mxu1 %v293_v8 }
  0x1c   :  { %261 = vmatprep.subr.bf16.mxu0 %v294_v9  ;;  %278 = vmatprep.subr.bf16.mxu1 %v294_v9 }
  0x1f   :  { %262 = vmatpush3.bf16.msra.mxu0 %v294_v9  ;;  %286 = vmatpush3.bf16.msra.mxu1 %v294_v9 }
  0x22   :  { %264 = vmatmul.mubr.bf16.vlgmr.msra.gmra.mrb[0].mxu0 %v297_v10  ;;  %268 = vmatmul.mubr.bf16.vlgmr.msra.gmra.mrb[0].mxu1 %v298_v11 }
  0xf5   :  { %v265_v13 = vpop.f32.mrb[0].mxu0  ;;  %v269_v15 = vpop.f32.mrb[0].mxu1 }
  0xf6   :  { %v164_v17 = vadd.f32 %v265_v13, %v222_v12  ;;  %v180_v18 = vadd.f32 %v269_v15, %v222_v12  ;;  %v155_v19 = vpop.f32.mrb[1].mxu0  ;;  %v171_v21 = vpop.f32.mrb[1].mxu1 }
  0xf7   :  { %v156_v23 = vadd.f32 %v222_v12, %v155_v19  ;;  %v172_v24 = vadd.f32 %v222_v12, %v171_v21  ;;  %v266_v25 = vpop.f32.mrb[2].mxu0  ;;  %v270_v27 = vpop.f32.mrb[2].mxu1 }
  0xf8   :  { %v196_v29 = vadd.f32 %v188_v14, %v164_v17  ;;  %v200_v30 = vadd.f32 %v192_v16, %v180_v18  ;;  %v167_v31 = vadd.f32 %v266_v25, %v222_v12  ;;  %v183_v32 = vadd.f32 %v270_v27, %v222_v12  ;;  %v158_v33 = vpop.f32.mrb[3].mxu0  ;;  %v174_v35 = vpop.f32.mrb[3].mxu1 }
  0xf9   :  { %v194_v37 = vadd.f32 %v186_v20, %v156_v23  ;;  %v198_v38 = vadd.f32 %v190_v22, %v172_v24  ;;  %v159_v39 = vadd.f32 %v222_v12, %v158_v33  ;;  %v175_v40 = vadd.f32 %v222_v12, %v174_v35 }
  0xfa   :  { %v204_v41 = vmax.f32 %v196_v29, 0.0  ;;  %v208_v42 = vmax.f32 %v200_v30, 0.0  ;;  %v197_v43 = vadd.f32 %v189_v26, %v167_v31  ;;  %v201_v44 = vadd.f32 %v193_v28, %v183_v32 }
  0xfb   :  { %v202_v45 = vmax.f32 %v194_v37, 0.0  ;;  %v206_v46 = vmax.f32 %v198_v38, 0.0  ;;  %v195_v47 = vadd.f32 %v187_v34, %v159_v39  ;;  %v199_v48 = vadd.f32 %v191_v36, %v175_v40 }
  0xfc   :  { %212 = vst [vmem:[%s415_s4 + $0x10] sm:$0xff] %v204_v41  ;;  %216 = vst [vmem:[%s415_s4 + $0x30] sm:$0xff] %v208_v42  ;;  %v205_v49 = vmax.f32 %v197_v43, 0.0  ;;  %v209_v50 = vmax.f32 %v201_v44, 0.0 }
  0xfd   :  { %210 = vst [vmem:[%s415_s4] sm:$0xff] %v202_v45  ;;  %214 = vst [vmem:[%s415_s4 + $0x20] sm:$0xff] %v206_v46  ;;  %v203_v51 = vmax.f32 %v195_v47, 0.0  ;;  %v207_v52 = vmax.f32 %v199_v48, 0.0 }
  0xfe   :  { %213 = vst [vmem:[%s415_s4 + $0x18] sm:$0xff] %v205_v49  ;;  %217 = vst [vmem:[%s415_s4 + $0x38] sm:$0xff] %v209_v50 }
  0xff   :  { %211 = vst [vmem:[%s415_s4 + $0x8] sm:$0xff] %v203_v51  ;;  %215 = vst [vmem:[%s415_s4 + $0x28] sm:$0xff] %v207_v52 }

// kernel: bottleneck_forward.5
= control target key start
LH: loop header
LB: loop body
LE: loop exit
PB: predicated region body
PF: predicated region fallthrough
CT: control target
= control target key end

     0   :  { %s1621_s1 = inlined_call_operand.vmem [shape: bf16[896,128], index: 1, kind: input, shape index: {}]   ;;  %s1622_s0 = inlined_call_operand.vmem [shape: bf16[64,896], index: 0, kind: input, shape index: {}]   ;;  %s1623_s2 = inlined_call_operand.vmem [shape: f32[1,128], index: 2, kind: input, shape index: {}]   ;;  %s1624_s3 = inlined_call_operand.vmem [shape: bf16[64,128], index: 3, kind: output, shape index: {}]  }
   0x1   :  { %v1238_v0 = vld [vmem:[%s1621_s1 + $0x40] sm:$0xff]   ;;  %v1242_v4 = vld [vmem:[%s1621_s1 + $0x48] sm:$0xff]   ;;  %v1246_v8 = vld [vmem:[%s1621_s1 + $0x50] sm:$0xff]  }
   0x2   :  { %v1239_v1 = vld [vmem:[%s1621_s1] sm:$0xff]   ;;  %1082 = vmatprep.subr.bf16.mxu0 %v1238_v0  ;;  %v1243_v5 = vld [vmem:[%s1621_s1 + $0x8] sm:$0xff]   ;;  %v1247_v9 = vld [vmem:[%s1621_s1 + $0x10] sm:$0xff]  }
   0x3   :  { %v1240_v2 = vld [vmem:[%s1621_s1 + $0xc0] sm:$0xff]   ;;  %1083 = vmatpush3.bf16.msra.mxu0 %v1239_v1  ;;  %v1244_v6 = vld [vmem:[%s1621_s1 + $0xc8] sm:$0xff]   ;;  %v1248_v10 = vld [vmem:[%s1621_s1 + $0xd0] sm:$0xff]  }
   0x4   :  { %v1241_v3 = vld [vmem:[%s1621_s1 + $0x80] sm:$0xff]   ;;  %1122 = vmatprep.subr.bf16.mxu1 %v1240_v2  ;;  %1084 = vmatprep.subr.bf16.mxu0 %v1242_v4  ;;  %v1245_v7 = vld [vmem:[%s1621_s1 + $0x88] sm:$0xff]   ;;  %v1249_v11 = vld [vmem:[%s1621_s1 + $0x90] sm:$0xff]  }
   0x5   :  { %1123 = vmatpush3.bf16.msra.mxu1 %v1241_v3  ;;  %v1250_v12 = vld [vmem:[%s1621_s1 + $0x58] sm:$0xff]   ;;  %v1254_v16 = vld [vmem:[%s1621_s1 + $0x60] sm:$0xff]   ;;  %v1258_v20 = vld [vmem:[%s1621_s1 + $0x68] sm:$0xff]  }
   0x6   :  { %1124 = vmatprep.subr.bf16.mxu1 %v1244_v6  ;;  %v1251_v13 = vld [vmem:[%s1621_s1 + $0x18] sm:$0xff]   ;;  %v1255_v17 = vld [vmem:[%s1621_s1 + $0x20] sm:$0xff]   ;;  %v1259_v21 = vld [vmem:[%s1621_s1 + $0x28] sm:$0xff]  }
   0x7   :  { %1085 = vmatpush3.bf16.msra.mxu0 %v1243_v5  ;;  %v1252_v14 = vld [vmem:[%s1621_s1 + $0xd8] sm:$0xff]   ;;  %v1256_v18 = vld [vmem:[%s1621_s1 + $0xe0] sm:$0xff]   ;;  %v1260_v22 = vld [vmem:[%s1621_s1 + $0xe8] sm:$0xff]  }
   0x8   :  { %1086 = vmatprep.subr.bf16.mxu0 %v1246_v8  ;;  %v1253_v15 = vld [vmem:[%s1621_s1 + $0x98] sm:$0xff]   ;;  %v1257_v19 = vld [vmem:[%s1621_s1 + $0xa0] sm:$0xff]   ;;  %v1261_v23 = vld [vmem:[%s1621_s1 + $0xa8] sm:$0xff]  }
   0x9   :  { %1125 = vmatpush3.bf16.msra.mxu1 %v1245_v7  ;;  %v1262_v24 = vld [vmem:[%s1621_s1 + $0x70] sm:$0xff]   ;;  %v1266_v28 = vld [vmem:[%s1621_s1 + $0x78] sm:$0xff]   ;;  %v1271_v32 = vld [vmem:[%s1622_s0 + $0x4] ss:$28 sps:$4 sm:$0xff]  }
   0xa   :  { %1126 = vmatprep.subr.bf16.mxu1 %v1248_v10  ;;  %v1263_v25 = vld [vmem:[%s1621_s1 + $0x30] sm:$0xff]   ;;  %v1267_v29 = vld [vmem:[%s1621_s1 + $0x38] sm:$0xff]   ;;  %678 = vmatprep.mubr.bf16.mxu0 %v1271_v32  ;;  %v1273_v34 = vld [vmem:[%s1621_s1 + $0x140] sm:$0xff]  }
   0xb   :  { %1087 = vmatpush3.bf16.msra.mxu0 %v1247_v9  ;;  %v1264_v26 = vld [vmem:[%s1621_s1 + $0xf0] sm:$0xff]   ;;  %v1268_v30 = vld [vmem:[%s1621_s1 + $0xf8] sm:$0xff]   ;;  %v1274_v35 = vld [vmem:[%s1622_s0 + $0x8] ss:$28 sps:$4 sm:$0xff]  }
   0xc   :  { %1088 = vmatprep.subr.bf16.mxu0 %v1250_v12  ;;  %v1265_v27 = vld [vmem:[%s1621_s1 + $0xb0] sm:$0xff]   ;;  %v1269_v31 = vld [vmem:[%s1622_s0] ss:$28 sps:$4 sm:$0xff]   ;;  %v1276_v36 = vld [vmem:[%s1622_s0 + $0xc] ss:$28 sps:$4 sm:$0xff]  }
   0xd   :  { %1127 = vmatpush3.bf16.msra.mxu1 %v1249_v11  ;;  %v1272_v33 = vld [vmem:[%s1621_s1 + $0xb8] sm:$0xff]   ;;  %v1277_v37 = vld [vmem:[%s1621_s1 + $0x100] sm:$0xff]   ;;  %743 = vmatprep.mubr.bf16.mxu1 %v1276_v36  ;;  %v1278_v38 = vld [vmem:[%s1621_s1 + $0x148] sm:$0xff]  }
   0xe   :  { %1128 = vmatprep.subr.bf16.mxu1 %v1252_v14  ;;  %v1279_v39 = vld [vmem:[%s1621_s1 + $0x180] sm:$0xff]   ;;  %v1280_v40 = vld [vmem:[%s1621_s1 + $0x108] sm:$0xff]   ;;  %v1281_v41 = vld [vmem:[%s1622_s0 + $0x3c] ss:$28 sps:$4 sm:$0xff]  }
   0xf   :  { %1089 = vmatpush3.bf16.msra.mxu0 %v1251_v13  ;;  %v1283_v42 = vld [vmem:[%s1622_s0 + $0x38] ss:$28 sps:$4 sm:$0xff]   ;;  %v1285_v44 = vld [vmem:[%s1621_s1 + $0x188] sm:$0xff]   ;;  %v1286_v45 = vld [vmem:[%s1622_s0 + $0x44] ss:$28 sps:$4 sm:$0xff]  }
  0x10   :  { %1090 = vmatprep.subr.bf16.mxu0 %v1254_v16  ;;  %v1284_v43 = vld [vmem:[%s1621_s1 + $0x150] sm:$0xff]   ;;  %v1289_v47 = vld [vmem:[%s1622_s0 + $0x40] ss:$28 sps:$4 sm:$0xff]   ;;  %v1302_v58 = vld [vmem:[%s1621_s1 + $0x168] sm:$0xff]  }
  0x11   :  { %1129 = vmatpush3.bf16.msra.mxu1 %v1253_v15  ;;  %v1288_v46 = vld [vmem:[%s1621_s1 + $0x110] sm:$0xff]   ;;  %v1290_v48 = vld [vmem:[%s1621_s1 + $0x158] sm:$0xff]   ;;  %v1296_v53 = vld [vmem:[%s1621_s1 + $0x160] sm:$0xff]  }
  0x12   :  { %1130 = vmatprep.subr.bf16.mxu1 %v1256_v18  ;;  %v1291_v49 = vld [vmem:[%s1621_s1 + $0x190] sm:$0xff]   ;;  %v1292_v50 = vld [vmem:[%s1621_s1 + $0x118] sm:$0xff]   ;;  %v1300_v56 = vld [vmem:[%s1621_s1 + $0x120] sm:$0xff]  }
  0x13   :  { %1091 = vmatpush3.bf16.msra.mxu0 %v1255_v17  ;;  %v1293_v51 = vld [vmem:[%s1622_s0 + $0x74] ss:$28 sps:$4 sm:$0xff]   ;;  %v1297_v54 = vld [vmem:[%s1621_s1 + $0x198] sm:$0xff]   ;;  %v1303_v59 = vld [vmem:[%s1621_s1 + $0x1a0] sm:$0xff]  }
  0x14   :  { %1092 = vmatprep.subr.bf16.mxu0 %v1258_v20  ;;  %v1295_v52 = vld [vmem:[%s1622_s0 + $0x70] ss:$28 sps:$4 sm:$0xff]   ;;  %v1298_v55 = vld [vmem:[%s1622_s0 + $0x7c] ss:$28 sps:$4 sm:$0xff]   ;;  %v1307_v62 = vld [vmem:[%s1622_s0 + $0xa8] ss:$28 sps:$4 sm:$0xff]  }
  0x15   :  { %1131 = vmatpush3.bf16.msra.mxu1 %v1257_v19  ;;  %v1301_v57 = vld [vmem:[%s1622_s0 + $0x78] ss:$28 sps:$4 sm:$0xff]   ;;  %v1304_v60 = vld [vmem:[%s1621_s1 + $0x128] sm:$0xff]   ;;  %v1326_v15 = vld [vmem:[%s1622_s0 + $0x84] ss:$28 sps:$4 sm:$0xff]  }
  0x16   :  { %1132 = vmatprep.subr.bf16.mxu1 %v1260_v22  ;;  %v1305_v61 = vld [vmem:[%s1622_s0 + $0xac] ss:$28 sps:$4 sm:$0xff]   ;;  %v1308_v63 = vld [vmem:[%s1621_s1 + $0x170] sm:$0xff]   ;;  %v1314_v4 = vld [vmem:[%s1621_s1 + $0x178] sm:$0xff]  }
  0x17   :  { %1093 = vmatpush3.bf16.msra.mxu0 %v1259_v21  ;;  %v1309_v0 = vld [vmem:[%s1621_s1 + $0x1a8] sm:$0xff]   ;;  %v1310_v1 = vld [vmem:[%s1622_s0 + $0xb4] ss:$28 sps:$4 sm:$0xff]   ;;  %v1316_v6 = vld [vmem:[%s1621_s1 + $0x138] sm:$0xff]  }
  0x18   :  { %1094 = vmatprep.subr.bf16.mxu0 %v1262_v24  ;;  %v1312_v2 = vld [vmem:[%s1621_s1 + $0x130] sm:$0xff]   ;;  %v1320_v9 = vld [vmem:[%s1621_s1 + $0x1b8] sm:$0xff]   ;;  %v1323_v12 = vld [vmem:[%s1622_s0 + $0x4c] ss:$28 sps:$4 sm:$0xff]  }
  0x19   :  { %1133 = vmatpush3.bf16.msra.mxu1 %v1261_v23  ;;  %v1313_v3 = vld [vmem:[%s1622_s0 + $0xb0] ss:$28 sps:$4 sm:$0xff]   ;;  %v1321_v10 = vld [vmem:[%s1622_s0 + $0x18] ss:$28 sps:$4 sm:$0xff]   ;;  %v1329_v13 = vld [vmem:[%s1622_s0 + $0x88] ss:$28 sps:$4 sm:$0xff]  }
  0x1a   :  { %1134 = vmatprep.subr.bf16.mxu1 %v1264_v26  ;;  %v1315_v5 = vld [vmem:[%s1621_s1 + $0x1b0] sm:$0xff]   ;;  %v1325_v14 = vld [vmem:[%s1622_s0 + $0x48] ss:$28 sps:$4 sm:$0xff]   ;;  %v1330_v16 = vld [vmem:[%s1622_s0 + $0xc0] ss:$28 sps:$4 sm:$0xff]  }
  0x1b   :  { %1095 = vmatpush3.bf16.msra.mxu0 %v1263_v25  ;;  %v1317_v7 = vld [vmem:[%s1622_s0 + $0x10] ss:$28 sps:$4 sm:$0xff]   ;;  %v1328_v17 = vld [vmem:[%s1622_s0 + $0x80] ss:$28 sps:$4 sm:$0xff]   ;;  %v1333_v19 = vld [vmem:[%s1622_s0 + $0xb8] ss:$28 sps:$4 sm:$0xff]  }
  0x1c   :  { %1096 = vmatprep.subr.bf16.mxu0 %v1266_v28  ;;  %v1319_v8 = vld [vmem:[%s1622_s0 + $0x14] ss:$28 sps:$4 sm:$0xff]   ;;  %v1331_v18 = vld [vmem:[%s1622_s0 + $0xbc] ss:$28 sps:$4 sm:$0xff]   ;;  %v958_v21 = vld [vmem:[%s1623_s2] ss:$0 sm:$0xff] }
  0x1d   :  { %1135 = vmatpush3.bf16.msra.mxu1 %v1265_v27  ;;  %v1322_v11 = vld [vmem:[%s1622_s0 + $0x50] ss:$28 sps:$4 sm:$0xff]  }
  0x1e   :  { %1136 = vmatprep.subr.bf16.mxu1 %v1268_v30 }
  0x1f   :  { %1097 = vmatpush3.bf16.msra.mxu0 %v1267_v29 }
  0x20   :  { %1162 = vmatprep.subr.bf16.mxu0 %v1273_v34 }
  0x21   :  { %1137 = vmatpush3.bf16.msra.mxu1 %v1272_v33 }
  0x22   :  { %679 = vmatmul.mubr.bf16.vlgmr.msra.gmra.mrb[0].mxu0 %v1269_v31  ;;  %1214 = vmatprep.subr.bf16.mxu1 %v1279_v39 }
  0x23   :  { %1163 = vmatpush3.bf16.msra.mxu0 %v1277_v37  ;;  %686 = vmatprep.mubr.bf16.mxu0 %v1281_v41 }
  0x24   :  { %744 = vmatmul.mubr.bf16.vlgmr.msra.gmra.mrb[0].mxu1 %v1274_v35  ;;  %1164 = vmatprep.subr.bf16.mxu0 %v1278_v38 }
  0x25   :  { %1215 = vmatpush3.bf16.msra.mxu1 %v1279_v39  ;;  %751 = vmatprep.mubr.bf16.mxu1 %v1286_v45 }
  0x26   :  { %1216 = vmatprep.subr.bf16.mxu1 %v1285_v44 }
  0x27   :  { %1165 = vmatpush3.bf16.msra.mxu0 %v1280_v40 }
  0x28   :  { %1166 = vmatprep.subr.bf16.mxu0 %v1284_v43 }
  0x29   :  { %1217 = vmatpush3.bf16.msra.mxu1 %v1285_v44 }
  0x2a   :  { %687 = vmatmul.mubr.bf16.gmra.mrb[4].mxu0 %v1283_v42  ;;  %1218 = vmatprep.subr.bf16.mxu1 %v1291_v49 }
  0x2b   :  { %1167 = vmatpush3.bf16.msra.mxu0 %v1288_v46  ;;  %694 = vmatprep.mubr.bf16.mxu0 %v1293_v51 }
  0x2c   :  { %752 = vmatmul.mubr.bf16.gmra.mrb[4].mxu1 %v1289_v47  ;;  %1168 = vmatprep.subr.bf16.mxu0 %v1290_v48 }
  0x2d   :  { %1219 = vmatpush3.bf16.msra.mxu1 %v1291_v49  ;;  %759 = vmatprep.mubr.bf16.mxu1 %v1298_v55 }
  0x2e   :  { %1220 = vmatprep.subr.bf16.mxu1 %v1297_v54 }
  0x2f   :  { %1169 = vmatpush3.bf16.msra.mxu0 %v1292_v50 }
  0x30   :  { %1170 = vmatprep.subr.bf16.mxu0 %v1296_v53 }
  0x31   :  { %1221 = vmatpush3.bf16.msra.mxu1 %v1297_v54 }
  0x32   :  { %695 = vmatmul.mubr.bf16.gmra.mrb[8].mxu0 %v1295_v52  ;;  %1222 = vmatprep.subr.bf16.mxu1 %v1303_v59 }
  0x33   :  { %1171 = vmatpush3.bf16.msra.mxu0 %v1300_v56  ;;  %702 = vmatprep.mubr.bf16.mxu0 %v1305_v61 }
  0x34   :  { %760 = vmatmul.mubr.bf16.gmra.mrb[8].mxu1 %v1301_v57  ;;  %1172 = vmatprep.subr.bf16.mxu0 %v1302_v58 }
  0x35   :  { %1223 = vmatpush3.bf16.msra.mxu1 %v1303_v59  ;;  %767 = vmatprep.mubr.bf16.mxu1 %v1310_v1 }
  0x36   :  { %1224 = vmatprep.subr.bf16.mxu1 %v1309_v0 }
  0x37   :  { %1173 = vmatpush3.bf16.msra.mxu0 %v1304_v60 }
  0x38   :  { %1174 = vmatprep.subr.bf16.mxu0 %v1308_v63 }
  0x39   :  { %1225 = vmatpush3.bf16.msra.mxu1 %v1309_v0 }
  0x3a   :  { %703 = vmatmul.mubr.bf16.gmra.mrb[12].mxu0 %v1307_v62  ;;  %1226 = vmatprep.subr.bf16.mxu1 %v1315_v5 }
  0x3b   :  { %1175 = vmatpush3.bf16.msra.mxu0 %v1312_v2  ;;  %808 = vmatprep.mubr.bf16.mxu0 %v1319_v8 }
  0x3c   :  { %768 = vmatmul.mubr.bf16.gmra.mrb[12].mxu1 %v1313_v3  ;;  %1176 = vmatprep.subr.bf16.mxu0 %v1314_v4 }
  0x3d   :  { %1227 = vmatpush3.bf16.msra.mxu1 %v1315_v5  ;;  %1230 = vmatprep.mubr.bf16.mxu1 %v1321_v10 }
  0x3e   :  { %1228 = vmatprep.subr.bf16.mxu1 %v1320_v9 }
  0x3f   :  { %1177 = vmatpush3.bf16.msra.mxu0 %v1316_v6 }
  0x41   :  { %1229 = vmatpush3.bf16.msra.mxu1 %v1320_v9 }
  0x42   :  { %809 = vmatmul.mubr.bf16.vlgmr.msra.gmra.mrb[16].mxu0 %v1317_v7 }
  0x43   :  { %816 = vmatprep.mubr.bf16.mxu0 %v1323_v12 }
  0x44   :  { %1231 = vmatmul.mubr.bf16.vlgmr.msra.gmra.mrb[16].mxu1 %v1322_v11 }
  0x45   :  { %1234 = vmatprep.mubr.bf16.mxu1 %v1329_v13 }
  0x4a   :  { %817 = vmatmul.mubr.bf16.gmra.mrb[20].mxu0 %v1325_v14 }
  0x4b   :  { %824 = vmatprep.mubr.bf16.mxu0 %v1326_v15 }
  0x4c   :  { %1235 = vmatmul.mubr.bf16.gmra.mrb[20].mxu1 %v1330_v16 }
  0x52   :  { %825 = vmatmul.mubr.bf16.gmra.mrb[24].mxu0 %v1328_v17 }
  0x53   :  { %832 = vmatprep.mubr.bf16.mxu0 %v1331_v18 }
  0x5a   :  { %833 = vmatmul.mubr.bf16.gmra.mrb[28].mxu0 %v1333_v19 }
  0xf5   :  { %v1098_v20 = vpop.f32.mrb[0].mxu0 }
  0xf6   :  { %v1099_v22 = vpop.f32.mrb[1].mxu0 }
  0xf7   :  { %v1100_v23 = vadd.f32 %v1099_v22, %v1098_v20  ;;  %v1101_v24 = vpop.f32.mrb[2].mxu0  ;;  %v1138_v25 = vpop.f32.mrb[0].mxu1 }
  0xf8   :  { %v1102_v26 = vpop.f32.mrb[3].mxu0  ;;  %v1139_v29 = vpop.f32.mrb[1].mxu1 }
  0xf9   :  { %v681_v27 = vadd.f32 %v1100_v23, %v958_v21  ;;  %v1103_v28 = vadd.f32 %v1102_v26, %v1101_v24  ;;  %v1140_v30 = vadd.f32 %v1139_v29, %v1138_v25  ;;  %v1141_v31 = vpop.f32.mrb[2].mxu1 }
  0xfa   :  { %v1142_v33 = vpop.f32.mrb[3].mxu1 }
  0xfb   :  { %v684_v32 = vadd.f32 %v1103_v28, %v958_v21  ;;  %v746_v34 = vadd.f32 %v1140_v30, %v681_v27  ;;  %v1143_v35 = vadd.f32 %v1142_v33, %v1141_v31 }
  0xfd   :  { %v1104_v36 = vpop.f32.mrb[4].mxu0  ;;  %v749_v37 = vadd.f32 %v1143_v35, %v684_v32 }
  0xfe   :  { %v1105_v38 = vpop.f32.mrb[5].mxu0 }
  0xff   :  { %v1106_v39 = vadd.f32 %v1105_v38, %v1104_v36  ;;  %v1107_v40 = vpop.f32.mrb[6].mxu0  ;;  %v1144_v43 = vpop.f32.mrb[4].mxu1 }
 0x100   :  { %v1108_v41 = vpop.f32.mrb[7].mxu0  ;;  %v1145_v45 = vpop.f32.mrb[5].mxu1 }
 0x101   :  { %v689_v42 = vadd.f32 %v1106_v39, %v958_v21  ;;  %v1109_v44 = vadd.f32 %v1108_v41, %v1107_v40  ;;  %v1146_v47 = vadd.f32 %v1145_v45, %v1144_v43  ;;  %v1147_v48 = vpop.f32.mrb[6].mxu1 }
 0x102   :  { %v1148_v49 = vpop.f32.mrb[7].mxu1 }
 0x103   :  { %v692_v46 = vadd.f32 %v1109_v44, %v958_v21  ;;  %v754_v50 = vadd.f32 %v1146_v47, %v689_v42  ;;  %v1149_v51 = vadd.f32 %v1148_v49, %v1147_v48 }
 0x105   :  { %v1110_v52 = vpop.f32.mrb[8].mxu0  ;;  %v757_v53 = vadd.f32 %v1149_v51, %v692_v46 }
 0x106   :  { %v1111_v54 = vpop.f32.mrb[9].mxu0 }
 0x107   :  { %v1112_v55 = vadd.f32 %v1111_v54, %v1110_v52  ;;  %v1113_v56 = vpop.f32.mrb[10].mxu0  ;;  %v1150_v57 = vpop.f32.mrb[8].mxu1 }
 0x108   :  { %v1114_v58 = vpop.f32.mrb[11].mxu0  ;;  %v1151_v61 = vpop.f32.mrb[9].mxu1 }
 0x109   :  { %v697_v59 = vadd.f32 %v1112_v55, %v958_v21  ;;  %v1115_v60 = vadd.f32 %v1114_v58, %v1113_v56  ;;  %v1152_v62 = vadd.f32 %v1151_v61, %v1150_v57  ;;  %v1153_v63 = vpop.f32.mrb[10].mxu1 }
 0x10a   :  { %v1154_v1 = vpop.f32.mrb[11].mxu1 }
 0x10b   :  { %v700_v0 = vadd.f32 %v1115_v60, %v958_v21  ;;  %v762_v2 = vadd.f32 %v1152_v62, %v697_v59  ;;  %v1155_v3 = vadd.f32 %v1154_v1, %v1153_v63 }
 0x10d   :  { %v1116_v4 = vpop.f32.mrb[12].mxu0  ;;  %v765_v5 = vadd.f32 %v1155_v3, %v700_v0 }
 0x10e   :  { %v1117_v6 = vpop.f32.mrb[13].mxu0 }
 0x10f   :  { %v1118_v7 = vadd.f32 %v1117_v6, %v1116_v4  ;;  %v1119_v8 = vpop.f32.mrb[14].mxu0  ;;  %v1156_v11 = vpop.f32.mrb[12].mxu1 }
 0x110   :  { %v1120_v9 = vpop.f32.mrb[15].mxu0  ;;  %v1157_v13 = vpop.f32.mrb[13].mxu1 }
 0x111   :  { %v705_v10 = vadd.f32 %v1118_v7, %v958_v21  ;;  %v1121_v12 = vadd.f32 %v1120_v9, %v1119_v8  ;;  %v1158_v15 = vadd.f32 %v1157_v13, %v1156_v11  ;;  %v1159_v16 = vpop.f32.mrb[14].mxu1 }
 0x112   :  { %v1160_v17 = vpop.f32.mrb[15].mxu1 }
 0x113   :  { %v708_v14 = vadd.f32 %v1121_v12, %v958_v21  ;;  %v770_v18 = vadd.f32 %v1158_v15, %v705_v10  ;;  %v1161_v19 = vadd.f32 %v1160_v17, %v1159_v16 }
 0x115   :  { %v773_v20 = vadd.f32 %v1161_v19, %v708_v14  ;;  %v1178_v22 = vpop.f32.mrb[16].mxu0 }
 0x116   :  { %v1179_v23 = vpop.f32.mrb[17].mxu0 }
 0x117   :  { %v1180_v24 = vadd.f32 %v1179_v23, %v1178_v22  ;;  %v1181_v25 = vpop.f32.mrb[18].mxu0  ;;  %v1232_v27 = vpop.f32.mrb[16].mxu1 }
 0x118   :  { %v1182_v26 = vpop.f32.mrb[19].mxu0  ;;  %v875_v30 = vpop.f32.mrb[17].mxu1 }
 0x119   :  { %v1183_v28 = vadd.f32 %v1182_v26, %v1181_v25  ;;  %v811_v29 = vadd.f32 %v1180_v24, %v746_v34  ;;  %v1233_v31 = vpop.f32.mrb[18].mxu1 }
 0x11a   :  { %v878_v35 = vpop.f32.mrb[19].mxu1 }
 0x11b   :  { %v876_v32 = vadd.f32 %v875_v30, %v811_v29  ;;  %v814_v33 = vadd.f32 %v1183_v28, %v749_v37 }
 0x11d   :  { %v879_v21 = vadd.f32 %v878_v35, %v814_v33  ;;  %v1184_v36 = vpop.f32.mrb[20].mxu0  ;;  %v906_v39 = vmax.f32 %v876_v32, 0.0 }
 0x11e   :  { %v1185_v38 = vpop.f32.mrb[21].mxu0 }
 0x11f   :  { %v907_v40 = vmax.f32 %v879_v21, 0.0  ;;  %v1186_v41 = vadd.f32 %v1185_v38, %v1184_v36  ;;  %v1187_v42 = vpop.f32.mrb[22].mxu0  ;;  %v1236_v44 = vpop.f32.mrb[20].mxu1 }
 0x120   :  { %v1188_v43 = vpop.f32.mrb[23].mxu0  ;;  %v891_v48 = vpop.f32.mrb[21].mxu1 }
 0x121   :  { %v1062_v45 = vpack.c.bf16 %v907_v40, %v906_v39  ;;  %v819_v46 = vadd.f32 %v1186_v41, %v754_v50  ;;  %v1189_v47 = vadd.f32 %v1188_v43, %v1187_v42  ;;  %v1237_v49 = vpop.f32.mrb[22].mxu1 }
 0x122   :  { %v894_v51 = vpop.f32.mrb[23].mxu1 }
 0x123   :  { %1063 = vst [vmem:[%s1624_s3] sm:$0xff] %v1062_v45   ;;  %v884_v34 = vadd.f32 %v1232_v27, %v819_v46  ;;  %v822_v37 = vadd.f32 %v1189_v47, %v757_v53 }
 0x125   :  { %v887_v52 = vadd.f32 %v1233_v31, %v822_v37  ;;  %v1190_v54 = vpop.f32.mrb[24].mxu0  ;;  %v908_v56 = vmax.f32 %v884_v34, 0.0 }
 0x126   :  { %v1191_v55 = vpop.f32.mrb[25].mxu0 }
 0x127   :  { %v909_v57 = vmax.f32 %v887_v52, 0.0  ;;  %v1192_v58 = vadd.f32 %v1191_v55, %v1190_v54  ;;  %v1193_v59 = vpop.f32.mrb[26].mxu0 }
 0x128   :  { %v1194_v60 = vpop.f32.mrb[27].mxu0 }
 0x129   :  { %v1067_v61 = vpack.c.bf16 %v909_v57, %v908_v56  ;;  %v1195_v50 = vadd.f32 %v1194_v60, %v1193_v59  ;;  %v827_v62 = vadd.f32 %v1192_v58, %v762_v2 }
 0x12b   :  { %1079 = vst [vmem:[%s1624_s3 + $0x8] sm:$0xff] %v1067_v61   ;;  %v892_v63 = vadd.f32 %v891_v48, %v827_v62  ;;  %v830_v0 = vadd.f32 %v1195_v50, %v765_v5 }
 0x12d   :  { %v895_v1 = vadd.f32 %v894_v51, %v830_v0  ;;  %v1196_v53 = vpop.f32.mrb[28].mxu0  ;;  %v910_v4 = vmax.f32 %v892_v63, 0.0 }
 0x12e   :  { %v1197_v3 = vpop.f32.mrb[29].mxu0 }
 0x12f   :  { %v911_v6 = vmax.f32 %v895_v1, 0.0  ;;  %v1198_v7 = vadd.f32 %v1197_v3, %v1196_v53  ;;  %v1199_v8 = vpop.f32.mrb[30].mxu0 }
 0x130   :  { %v1200_v9 = vpop.f32.mrb[31].mxu0 }
 0x131   :  { %v1072_v10 = vpack.c.bf16 %v911_v6, %v910_v4  ;;  %v835_v11 = vadd.f32 %v1198_v7, %v770_v18  ;;  %v1201_v12 = vadd.f32 %v1200_v9, %v1199_v8 }
 0x133   :  { %1080 = vst [vmem:[%s1624_s3 + $0x10] sm:$0xff] %v1072_v10   ;;  %v900_v2 = vadd.f32 %v1236_v44, %v835_v11  ;;  %v838_v13 = vadd.f32 %v1201_v12, %v773_v20 }
 0x135   :  { %v903_v14 = vadd.f32 %v1237_v49, %v838_v13  ;;  %v912_v15 = vmax.f32 %v900_v2, 0.0 }
 0x137   :  { %v913_v5 = vmax.f32 %v903_v14, 0.0 }
 0x139   :  { %v1077_v16 = vpack.c.bf16 %v913_v5, %v912_v15 }
 0x13b   :  { %1081 = vst [vmem:[%s1624_s3 + $0x18] sm:$0xff] %v1077_v16  }

</bundles_post_ra>
